<compile_context>
chip_gen: v7x
topology: tpu7x:2x2x1
jax: 0.10.0
libtpu: 0.0.40
codegen_flags: <defaults>
</compile_context>

<pallas_src>
import jax
import jax.numpy as jnp
from jax import lax
from jax.experimental import pallas as pl
from jax.experimental.pallas import tpu as pltpu


def _pam_kernel(gamma_ref,          # SMEM (1,)               learnable gamma
                xq_ref,             # VMEM (1, Tq, C)          query-row slab (also residual)
                xkv_ref,            # VMEM (1, Tk, C)          key/value-row slab
                wq_ref, wk_ref,     # VMEM (C8, C)             1x1 conv weights (resident)
                wv_ref,             # VMEM (C, C)
                bq_ref, bk_ref,     # VMEM (1, C8)             biases (resident)
                bv_ref,             # VMEM (1, C)
                o_ref,              # VMEM (1, Tq, C)          output block
                acc_ref,            # VMEM (Tq, C)  f32        online-softmax numerator acc
                m_ref,              # VMEM (Tq, 1)  f32        running row max
                l_ref):             # VMEM (Tq, 1)  f32        running row sum
    ki = pl.program_id(2)
    n_kv = pl.num_programs(2)

    @pl.when(ki == 0)
    def _init():
        m_ref[...] = jnp.full(m_ref.shape, -jnp.inf, m_ref.dtype)
        l_ref[...] = jnp.zeros(l_ref.shape, l_ref.dtype)
        acc_ref[...] = jnp.zeros(acc_ref.shape, acc_ref.dtype)

    x_q = xq_ref[0]                       # (Tq, C) f32 — kept in f32 for the residual add
    x_kv = xkv_ref[0]                     # (Tk, C) f32

    # bf16 operands for the MXU; accumulation stays f32.
    xq_b = x_q.astype(jnp.bfloat16)
    xkv_b = x_kv.astype(jnp.bfloat16)
    wq = wq_ref[...].astype(jnp.bfloat16)     # (C8, C)
    wk = wk_ref[...].astype(jnp.bfloat16)     # (C8, C)
    wv = wv_ref[...].astype(jnp.bfloat16)     # (C,  C)

    # Contract the channel (last) dim of both operands -> no transpose materialized.
    cdims = (((1,), (1,)), ((), ()))
    q = lax.dot_general(xq_b, wq, cdims,
                        preferred_element_type=jnp.float32) + bq_ref[...]   # (Tq, C8)
    k = lax.dot_general(xkv_b, wk, cdims,
                        preferred_element_type=jnp.float32) + bk_ref[...]   # (Tk, C8)
    v = lax.dot_general(xkv_b, wv, cdims,
                        preferred_element_type=jnp.float32) + bv_ref[...]   # (Tk, C)

    # energy tile (Tq, Tk) = q . k^T  (contraction dim = C//8, intentionally not padded)
    s = lax.dot_general(q.astype(jnp.bfloat16), k.astype(jnp.bfloat16), cdims,
                        preferred_element_type=jnp.float32)

    # Numerically stable online softmax (all f32).
    m_prev = m_ref[...]                                          # (Tq, 1)
    m_new = jnp.maximum(m_prev, jnp.max(s, axis=-1, keepdims=True))
    alpha = jnp.exp(m_prev - m_new)                              # rescale factor
    p = jnp.exp(s - m_new)                                       # (Tq, Tk) f32
    l_ref[...] = alpha * l_ref[...] + jnp.sum(p, axis=-1, keepdims=True)
    acc_ref[...] = alpha * acc_ref[...] + jnp.dot(
        p.astype(jnp.bfloat16), v.astype(jnp.bfloat16),
        preferred_element_type=jnp.float32)
    m_ref[...] = m_new

    @pl.when(ki == n_kv - 1)
    def _finalize():
        inv_l = pl.reciprocal(l_ref[...], approx=True)           # EUP, not a VALU divide
        attn_out = acc_ref[...] * inv_l                          # (Tq, C) f32
        gamma = gamma_ref[0]
        # Single lane-dense store (C is the lane axis) at the last kv step.
        o_ref[0] = (gamma * attn_out + x_q).astype(o_ref.dtype)


def _pick_tile(n, preferred):
    """Largest power-of-two tile <= preferred that divides n and is 8-aligned."""
    t = min(preferred, n)
    while t > 8:
        if n % t == 0 and t % 8 == 0:
            return t
        t //= 2
    return n


def pam_module_forward(x, wq, bq, wk, bk, wv, bv, gamma, *,
                       tq=256, tk=256, interpret=False):
    """PAM_Module forward.

    x:  (B, C, H, W) float
    wq: (C//8, C, 1, 1), bq: (C//8,)   query 1x1 conv
    wk: (C//8, C, 1, 1), bk: (C//8,)   key   1x1 conv
    wv: (C,    C, 1, 1), bv: (C,)      value 1x1 conv
    gamma: (1,) scalar parameter
    """
    B, C, H, W = x.shape
    N = H * W
    C8 = wq.shape[0]

    wq2 = wq.reshape(C8, C).astype(jnp.float32)
    wk2 = wk.reshape(C8, C).astype(jnp.float32)
    wv2 = wv.reshape(C, C).astype(jnp.float32)
    bq2 = bq.reshape(1, C8).astype(jnp.float32)
    bk2 = bk.reshape(1, C8).astype(jnp.float32)
    bv2 = bv.reshape(1, C).astype(jnp.float32)
    gamma2 = jnp.asarray(gamma, jnp.float32).reshape(1)

    # (B, C, H, W) -> (B, N, C): pixels on sublanes, channels on lanes.
    x_nc = jnp.transpose(x.reshape(B, C, N), (0, 2, 1)).astype(jnp.float32)

    tq = _pick_tile(N, tq)
    tk = _pick_tile(N, tk)
    grid = (B, N // tq, N // tk)           # kv (reduction) axis last

    grid_spec = pltpu.PrefetchScalarGridSpec(
        num_scalar_prefetch=0,
        grid=grid,
        in_specs=[
            pl.BlockSpec(memory_space=pltpu.MemorySpace.SMEM),           # gamma (scalar)
            pl.BlockSpec((1, tq, C), lambda b, qi, ki: (b, qi, 0)),      # x, query rows
            pl.BlockSpec((1, tk, C), lambda b, qi, ki: (b, ki, 0)),      # x, key/value rows
            pl.BlockSpec((C8, C), lambda b, qi, ki: (0, 0)),             # Wq (resident)
            pl.BlockSpec((C8, C), lambda b, qi, ki: (0, 0)),             # Wk (resident)
            pl.BlockSpec((C, C), lambda b, qi, ki: (0, 0)),              # Wv (resident)
            pl.BlockSpec((1, C8), lambda b, qi, ki: (0, 0)),             # bq
            pl.BlockSpec((1, C8), lambda b, qi, ki: (0, 0)),             # bk
            pl.BlockSpec((1, C), lambda b, qi, ki: (0, 0)),              # bv
        ],
        out_specs=pl.BlockSpec((1, tq, C), lambda b, qi, ki: (b, qi, 0)),
        scratch_shapes=[
            pltpu.VMEM((tq, C), jnp.float32),   # attn.v accumulator
            pltpu.VMEM((tq, 1), jnp.float32),   # running max  m
            pltpu.VMEM((tq, 1), jnp.float32),   # running sum  l
        ],
    )

    out_nc = pl.pallas_call(
        _pam_kernel,
        grid_spec=grid_spec,
        out_shape=jax.ShapeDtypeStruct((B, N, C), jnp.float32),
        compiler_params=pltpu.CompilerParams(
            # batch & q tiles are independent (megacore splittable); kv is the
            # reduction axis carrying the resident accumulator.
            dimension_semantics=("parallel", "parallel", "arbitrary"),
            # Explicit, generation-safe VMEM budget (fits v7x's 64 MiB too).
            vmem_limit_bytes=48 * 1024 * 1024,
        ),
        interpret=interpret,
    )(gamma2, x_nc, x_nc, wq2, wk2, wv2, bq2, bk2, bv2)

    return jnp.transpose(out_nc, (0, 2, 1)).reshape(B, C, H, W)


def _pam_reference(x, wq, bq, wk, bk, wv, bv, gamma):
    """Pure-JAX reference mirroring the PyTorch PAM_Module forward."""
    B, C, H, W = x.shape
    N = H * W
    C8 = wq.shape[0]
    x_nc = jnp.transpose(x.reshape(B, C, N), (0, 2, 1))          # (B, N, C)
    q = x_nc @ wq.reshape(C8, C).T + bq                          # (B, N, C8)
    k = x_nc @ wk.reshape(C8, C).T + bk                          # (B, N, C8)
    v = x_nc @ wv.reshape(C, C).T + bv                           # (B, N, C)
    energy = jnp.einsum('bqc,bkc->bqk', q, k)                    # (B, N, N)
    attn = jax.nn.softmax(energy, axis=-1)
    out_nc = gamma.reshape(()) * jnp.einsum('bqk,bkc->bqc', attn, v) + x_nc
    return jnp.transpose(out_nc, (0, 2, 1)).reshape(B, C, H, W)


if __name__ == "__main__":
    key = jax.random.PRNGKey(0)
    B, C, H, W = 2, 64, 16, 16        # C must be divisible by 8; N = H*W = 256
    C8 = C // 8
    ks = jax.random.split(key, 8)
    x = jax.random.normal(ks[0], (B, C, H, W), jnp.float32)
    wq = jax.random.normal(ks[1], (C8, C, 1, 1), jnp.float32) * 0.05
    bq = jax.random.normal(ks[2], (C8,), jnp.float32) * 0.05
    wk = jax.random.normal(ks[3], (C8, C, 1, 1), jnp.float32) * 0.05
    bk = jax.random.normal(ks[4], (C8,), jnp.float32) * 0.05
    wv = jax.random.normal(ks[5], (C, C, 1, 1), jnp.float32) * 0.05
    bv = jax.random.normal(ks[6], (C,), jnp.float32) * 0.05
    gamma = jnp.asarray([0.5], jnp.float32)   # nonzero so the attention path matters

    # tq=tk=128 -> 2x2 q/kv tiles per batch: exercises the online-softmax
    # accumulation across multiple kv steps even at this small demo size.
    out = pam_module_forward(x, wq, bq, wk, bk, wv, bv, gamma, tq=128, tk=128)
    out = jax.block_until_ready(out)

    ref = _pam_reference(x, wq, bq, wk, bk, wv, bv, gamma)
    err = float(jnp.max(jnp.abs(out - ref)))
    if err > 5e-2:   # loose tolerance: kernel uses bf16 MXU matmuls w/ f32 accumulation
        raise AssertionError(f"PAM kernel mismatch vs reference: max abs err = {err}")
    print("KERNEL_OK")
</pallas_src>

<mosaic_0001>
module attributes {stable_mosaic.version = 11 : i64} {
  func.func @_pam_kernel(%arg0: i32, %arg1: i32, %arg2: i32, %arg3: memref<1xf32, #tpu.memory_space<smem>>, %arg4: memref<1x128x64xf32, #tpu.memory_space<vmem>>, %arg5: memref<1x128x64xf32, #tpu.memory_space<vmem>>, %arg6: memref<8x64xf32, #tpu.memory_space<vmem>>, %arg7: memref<8x64xf32, #tpu.memory_space<vmem>>, %arg8: memref<64x64xf32, #tpu.memory_space<vmem>>, %arg9: memref<1x8xf32, #tpu.memory_space<vmem>>, %arg10: memref<1x8xf32, #tpu.memory_space<vmem>>, %arg11: memref<1x64xf32, #tpu.memory_space<vmem>>, %arg12: memref<1x128x64xf32, #tpu.memory_space<vmem>>, %arg13: memref<128x64xf32, #tpu.memory_space<vmem>>, %arg14: memref<128x1xf32, #tpu.memory_space<vmem>>, %arg15: memref<128x1xf32, #tpu.memory_space<vmem>>) attributes {dimension_semantics = [#tpu.dimension_semantics<parallel>, #tpu.dimension_semantics<parallel>, #tpu.dimension_semantics<arbitrary>], iteration_bounds = array<i64: 2, 2, 2>, scalar_prefetch = 0 : i64, scratch_operands = 3 : i64, tpu.core_type = #tpu.core_type<tc>, window_params = [{transform_indices = @transform_0, window_bounds = array<i64: 1>}, {transform_indices = @transform_1, window_bounds = array<i64: 1, 128, 64>}, {transform_indices = @transform_2, window_bounds = array<i64: 1, 128, 64>}, {pipeline_mode = #tpu.pipeline_mode<synchronous>, transform_indices = @transform_3, window_bounds = array<i64: 8, 64>}, {pipeline_mode = #tpu.pipeline_mode<synchronous>, transform_indices = @transform_4, window_bounds = array<i64: 8, 64>}, {pipeline_mode = #tpu.pipeline_mode<synchronous>, transform_indices = @transform_5, window_bounds = array<i64: 64, 64>}, {pipeline_mode = #tpu.pipeline_mode<synchronous>, transform_indices = @transform_6, window_bounds = array<i64: 1, 8>}, {pipeline_mode = #tpu.pipeline_mode<synchronous>, transform_indices = @transform_7, window_bounds = array<i64: 1, 8>}, {pipeline_mode = #tpu.pipeline_mode<synchronous>, transform_indices = @transform_8, window_bounds = array<i64: 1, 64>}, {transform_indices = @transform_9, window_bounds = array<i64: 1, 128, 64>}]} {
    %c0_i32 = arith.constant 0 : i32
    %0 = arith.cmpi eq, %arg2, %c0_i32 : i32
    %1 = arith.extui %0 : i1 to i32
    %c0_i32_0 = arith.constant 0 : i32
    %2 = arith.cmpi ne, %1, %c0_i32_0 : i32
    scf.if %2 {
      %cst_37 = arith.constant 0xFF800000 : f32
      %57 = vector.broadcast %cst_37 : f32 to vector<128x1xf32>
      %c0_38 = arith.constant 0 : index
      %c0_39 = arith.constant 0 : index
      %58 = vector.load %arg14[%c0_38, %c0_39] : memref<128x1xf32, #tpu.memory_space<vmem>>, vector<128x1xf32>
      tpu.vector_store %arg14[%c0_38, %c0_39], %57 {strides = array<i32>} : memref<128x1xf32, #tpu.memory_space<vmem>>, vector<128x1xf32>,
      %cst_40 = arith.constant 0.000000e+00 : f32
      %59 = vector.broadcast %cst_40 : f32 to vector<128x1xf32>
      %c0_41 = arith.constant 0 : index
      %c0_42 = arith.constant 0 : index
      %60 = vector.load %arg15[%c0_41, %c0_42] : memref<128x1xf32, #tpu.memory_space<vmem>>, vector<128x1xf32>
      tpu.vector_store %arg15[%c0_41, %c0_42], %59 {strides = array<i32>} : memref<128x1xf32, #tpu.memory_space<vmem>>, vector<128x1xf32>,
      %cst_43 = arith.constant 0.000000e+00 : f32
      %61 = vector.broadcast %cst_43 : f32 to vector<128x64xf32>
      %c0_44 = arith.constant 0 : index
      %c0_45 = arith.constant 0 : index
      %62 = vector.load %arg13[%c0_44, %c0_45] : memref<128x64xf32, #tpu.memory_space<vmem>>, vector<128x64xf32>
      tpu.vector_store %arg13[%c0_44, %c0_45], %61 {strides = array<i32>} : memref<128x64xf32, #tpu.memory_space<vmem>>, vector<128x64xf32>,
    } else {
    }
    %c0 = arith.constant 0 : index
    %c0_1 = arith.constant 0 : index
    %c0_2 = arith.constant 0 : index
    %3 = vector.load %arg4[%c0, %c0_1, %c0_2] : memref<1x128x64xf32, #tpu.memory_space<vmem>>, vector<1x128x64xf32>
    %4 = vector.shape_cast %3 : vector<1x128x64xf32> to vector<128x64xf32>
    %c0_3 = arith.constant 0 : index
    %c0_4 = arith.constant 0 : index
    %c0_5 = arith.constant 0 : index
    %5 = vector.load %arg5[%c0_3, %c0_4, %c0_5] : memref<1x128x64xf32, #tpu.memory_space<vmem>>, vector<1x128x64xf32>
    %6 = vector.shape_cast %5 : vector<1x128x64xf32> to vector<128x64xf32>
    %7 = arith.truncf %4 : vector<128x64xf32> to vector<128x64xbf16>
    %8 = arith.truncf %6 : vector<128x64xf32> to vector<128x64xbf16>
    %c0_6 = arith.constant 0 : index
    %c0_7 = arith.constant 0 : index
    %9 = vector.load %arg6[%c0_6, %c0_7] : memref<8x64xf32, #tpu.memory_space<vmem>>, vector<8x64xf32>
    %10 = arith.truncf %9 : vector<8x64xf32> to vector<8x64xbf16>
    %c0_8 = arith.constant 0 : index
    %c0_9 = arith.constant 0 : index
    %11 = vector.load %arg7[%c0_8, %c0_9] : memref<8x64xf32, #tpu.memory_space<vmem>>, vector<8x64xf32>
    %12 = arith.truncf %11 : vector<8x64xf32> to vector<8x64xbf16>
    %c0_10 = arith.constant 0 : index
    %c0_11 = arith.constant 0 : index
    %13 = vector.load %arg8[%c0_10, %c0_11] : memref<64x64xf32, #tpu.memory_space<vmem>>, vector<64x64xf32>
    %14 = arith.truncf %13 : vector<64x64xf32> to vector<64x64xbf16>
    %cst = arith.constant dense<0.000000e+00> : vector<128x8xf32>
    %15 = tpu.matmul %7, %10, %cst {dimension_numbers = #tpu.dot_dimension_numbers<[1], [1], [0], [0], [0, 0, 1, 0], [], []>} : vector<128x64xbf16>, vector<8x64xbf16>, vector<128x8xf32> -> vector<128x8xf32>
    %c0_12 = arith.constant 0 : index
    %c0_13 = arith.constant 0 : index
    %16 = vector.load %arg9[%c0_12, %c0_13] : memref<1x8xf32, #tpu.memory_space<vmem>>, vector<1x8xf32>
    %17 = vector.broadcast %16 : vector<1x8xf32> to vector<128x8xf32>
    %18 = arith.addf %15, %17 : vector<128x8xf32>
    %cst_14 = arith.constant dense<0.000000e+00> : vector<128x8xf32>
    %19 = tpu.matmul %8, %12, %cst_14 {dimension_numbers = #tpu.dot_dimension_numbers<[1], [1], [0], [0], [0, 0, 1, 0], [], []>} : vector<128x64xbf16>, vector<8x64xbf16>, vector<128x8xf32> -> vector<128x8xf32>
    %c0_15 = arith.constant 0 : index
    %c0_16 = arith.constant 0 : index
    %20 = vector.load %arg10[%c0_15, %c0_16] : memref<1x8xf32, #tpu.memory_space<vmem>>, vector<1x8xf32>
    %21 = vector.broadcast %20 : vector<1x8xf32> to vector<128x8xf32>
    %22 = arith.addf %19, %21 : vector<128x8xf32>
    %cst_17 = arith.constant dense<0.000000e+00> : vector<128x64xf32>
    %23 = tpu.matmul %8, %14, %cst_17 {dimension_numbers = #tpu.dot_dimension_numbers<[1], [1], [0], [0], [0, 0, 1, 0], [], []>} : vector<128x64xbf16>, vector<64x64xbf16>, vector<128x64xf32> -> vector<128x64xf32>
    %c0_18 = arith.constant 0 : index
    %c0_19 = arith.constant 0 : index
    %24 = vector.load %arg11[%c0_18, %c0_19] : memref<1x64xf32, #tpu.memory_space<vmem>>, vector<1x64xf32>
    %25 = vector.broadcast %24 : vector<1x64xf32> to vector<128x64xf32>
    %26 = arith.addf %23, %25 : vector<128x64xf32>
    %27 = arith.truncf %18 : vector<128x8xf32> to vector<128x8xbf16>
    %28 = arith.truncf %22 : vector<128x8xf32> to vector<128x8xbf16>
    %cst_20 = arith.constant dense<0.000000e+00> : vector<128x128xf32>
    %29 = tpu.matmul %27, %28, %cst_20 {dimension_numbers = #tpu.dot_dimension_numbers<[1], [1], [0], [0], [0, 0, 1, 0], [], []>} : vector<128x8xbf16>, vector<128x8xbf16>, vector<128x128xf32> -> vector<128x128xf32>
    %c0_21 = arith.constant 0 : index
    %c0_22 = arith.constant 0 : index
    %30 = vector.load %arg14[%c0_21, %c0_22] : memref<128x1xf32, #tpu.memory_space<vmem>>, vector<128x1xf32>
    %cst_23 = arith.constant dense<0xFF800000> : vector<128xf32>
    %31 = vector.multi_reduction <maximumf>, %29, %cst_23 [1] : vector<128x128xf32> to vector<128xf32>
    %32 = vector.shape_cast %31 : vector<128xf32> to vector<128x1xf32>
    %33 = arith.maximumf %30, %32 : vector<128x1xf32>
    %34 = arith.subf %30, %33 : vector<128x1xf32>
    %35 = math.exp %34 : vector<128x1xf32>
    %36 = vector.broadcast %33 : vector<128x1xf32> to vector<128x128xf32>
    %37 = arith.subf %29, %36 : vector<128x128xf32>
    %38 = math.exp %37 : vector<128x128xf32>
    %c0_24 = arith.constant 0 : index
    %c0_25 = arith.constant 0 : index
    %39 = vector.load %arg15[%c0_24, %c0_25] : memref<128x1xf32, #tpu.memory_space<vmem>>, vector<128x1xf32>
    %40 = arith.mulf %35, %39 : vector<128x1xf32>
    %cst_26 = arith.constant dense<0.000000e+00> : vector<128xf32>
    %41 = vector.multi_reduction <add>, %38, %cst_26 [1] : vector<128x128xf32> to vector<128xf32>
    %42 = vector.shape_cast %41 : vector<128xf32> to vector<128x1xf32>
    %43 = arith.addf %40, %42 : vector<128x1xf32>
    %c0_27 = arith.constant 0 : index
    %c0_28 = arith.constant 0 : index
    %44 = vector.load %arg15[%c0_27, %c0_28] : memref<128x1xf32, #tpu.memory_space<vmem>>, vector<128x1xf32>
    tpu.vector_store %arg15[%c0_27, %c0_28], %43 {strides = array<i32>} : memref<128x1xf32, #tpu.memory_space<vmem>>, vector<128x1xf32>,
    %c0_29 = arith.constant 0 : index
    %c0_30 = arith.constant 0 : index
    %45 = vector.load %arg13[%c0_29, %c0_30] : memref<128x64xf32, #tpu.memory_space<vmem>>, vector<128x64xf32>
    %46 = vector.broadcast %35 : vector<128x1xf32> to vector<128x64xf32>
    %47 = arith.mulf %46, %45 : vector<128x64xf32>
    %48 = arith.truncf %38 : vector<128x128xf32> to vector<128x128xbf16>
    %49 = arith.truncf %26 : vector<128x64xf32> to vector<128x64xbf16>
    %cst_31 = arith.constant dense<0.000000e+00> : vector<128x64xf32>
    %50 = tpu.matmul %48, %49, %cst_31 {dimension_numbers = #tpu.dot_dimension_numbers<[1], [0], [0], [1], [0, 0, 1, 1], [], []>} : vector<128x128xbf16>, vector<128x64xbf16>, vector<128x64xf32> -> vector<128x64xf32>
    %51 = arith.addf %47, %50 : vector<128x64xf32>
    %c0_32 = arith.constant 0 : index
    %c0_33 = arith.constant 0 : index
    %52 = vector.load %arg13[%c0_32, %c0_33] : memref<128x64xf32, #tpu.memory_space<vmem>>, vector<128x64xf32>
    tpu.vector_store %arg13[%c0_32, %c0_33], %51 {strides = array<i32>} : memref<128x64xf32, #tpu.memory_space<vmem>>, vector<128x64xf32>,
    %c0_34 = arith.constant 0 : index
    %c0_35 = arith.constant 0 : index
    %53 = vector.load %arg14[%c0_34, %c0_35] : memref<128x1xf32, #tpu.memory_space<vmem>>, vector<128x1xf32>
    tpu.vector_store %arg14[%c0_34, %c0_35], %33 {strides = array<i32>} : memref<128x1xf32, #tpu.memory_space<vmem>>, vector<128x1xf32>,
    %c1_i32 = arith.constant 1 : i32
    %54 = arith.cmpi eq, %arg2, %c1_i32 : i32
    %55 = arith.extui %54 : i1 to i32
    %c0_i32_36 = arith.constant 0 : i32
    %56 = arith.cmpi ne, %55, %c0_i32_36 : i32
    scf.if %56 {
      %c0_37 = arith.constant 0 : index
      %c0_38 = arith.constant 0 : index
      %57 = vector.load %arg15[%c0_37, %c0_38] : memref<128x1xf32, #tpu.memory_space<vmem>>, vector<128x1xf32>
      %58 = tpu.reciprocal %57 {approx = true} : vector<128x1xf32> -> vector<128x1xf32>
      %c0_39 = arith.constant 0 : index
      %c0_40 = arith.constant 0 : index
      %59 = vector.load %arg13[%c0_39, %c0_40] : memref<128x64xf32, #tpu.memory_space<vmem>>, vector<128x64xf32>
      %60 = vector.broadcast %58 : vector<128x1xf32> to vector<128x64xf32>
      %61 = arith.mulf %59, %60 : vector<128x64xf32>
      %c0_41 = arith.constant 0 : index
      %62 = memref.load %arg3[%c0_41] : memref<1xf32, #tpu.memory_space<smem>>
      %63 = vector.broadcast %62 : f32 to vector<128x64xf32>
      %64 = arith.mulf %63, %61 : vector<128x64xf32>
      %65 = arith.addf %64, %4 : vector<128x64xf32>
      %c0_42 = arith.constant 0 : index
      %c0_43 = arith.constant 0 : index
      %c0_44 = arith.constant 0 : index
      %66 = vector.load %arg12[%c0_42, %c0_43, %c0_44] : memref<1x128x64xf32, #tpu.memory_space<vmem>>, vector<1x128x64xf32>
      %67 = vector.shape_cast %66 : vector<1x128x64xf32> to vector<128x64xf32>
      %68 = vector.shape_cast %65 : vector<128x64xf32> to vector<1x128x64xf32>
      tpu.vector_store %arg12[%c0_42, %c0_43, %c0_44], %68 {strides = array<i32>} : memref<1x128x64xf32, #tpu.memory_space<vmem>>, vector<1x128x64xf32>,
    } else {
    }
    return
  }
  func.func @transform_0(%arg0: i32, %arg1: i32, %arg2: i32) -> i32 {
    %c0_i32 = arith.constant 0 : i32
    %c0_i32_0 = arith.constant 0 : i32
    return %c0_i32 : i32
  }
  func.func @transform_1(%arg0: i32, %arg1: i32, %arg2: i32) -> (i32, i32, i32) {
    %c0_i32 = arith.constant 0 : i32
    %c0_i32_0 = arith.constant 0 : i32
    return %arg0, %arg1, %c0_i32 : i32, i32, i32
  }
  func.func @transform_2(%arg0: i32, %arg1: i32, %arg2: i32) -> (i32, i32, i32) {
    %c0_i32 = arith.constant 0 : i32
    %c0_i32_0 = arith.constant 0 : i32
    return %arg0, %arg2, %c0_i32 : i32, i32, i32
  }
  func.func @transform_3(%arg0: i32, %arg1: i32, %arg2: i32) -> (i32, i32) {
    %c0_i32 = arith.constant 0 : i32
    %c0_i32_0 = arith.constant 0 : i32
    %c0_i32_1 = arith.constant 0 : i32
    return %c0_i32, %c0_i32_0 : i32, i32
  }
  func.func @transform_4(%arg0: i32, %arg1: i32, %arg2: i32) -> (i32, i32) {
    %c0_i32 = arith.constant 0 : i32
    %c0_i32_0 = arith.constant 0 : i32
    %c0_i32_1 = arith.constant 0 : i32
    return %c0_i32, %c0_i32_0 : i32, i32
  }
  func.func @transform_5(%arg0: i32, %arg1: i32, %arg2: i32) -> (i32, i32) {
    %c0_i32 = arith.constant 0 : i32
    %c0_i32_0 = arith.constant 0 : i32
    %c0_i32_1 = arith.constant 0 : i32
    return %c0_i32, %c0_i32_0 : i32, i32
  }
  func.func @transform_6(%arg0: i32, %arg1: i32, %arg2: i32) -> (i32, i32) {
    %c0_i32 = arith.constant 0 : i32
    %c0_i32_0 = arith.constant 0 : i32
    %c0_i32_1 = arith.constant 0 : i32
    return %c0_i32, %c0_i32_0 : i32, i32
  }
  func.func @transform_7(%arg0: i32, %arg1: i32, %arg2: i32) -> (i32, i32) {
    %c0_i32 = arith.constant 0 : i32
    %c0_i32_0 = arith.constant 0 : i32
    %c0_i32_1 = arith.constant 0 : i32
    return %c0_i32, %c0_i32_0 : i32, i32
  }
  func.func @transform_8(%arg0: i32, %arg1: i32, %arg2: i32) -> (i32, i32) {
    %c0_i32 = arith.constant 0 : i32
    %c0_i32_0 = arith.constant 0 : i32
    %c0_i32_1 = arith.constant 0 : i32
    return %c0_i32, %c0_i32_0 : i32, i32
  }
  func.func @transform_9(%arg0: i32, %arg1: i32, %arg2: i32) -> (i32, i32, i32) {
    %c0_i32 = arith.constant 0 : i32
    %c0_i32_0 = arith.constant 0 : i32
    return %arg0, %arg1, %c0_i32 : i32, i32, i32
  }
}

</mosaic_0001>

<bundles_post_ra>
// kernel: tpu_custom_call.1
= control target key start
LH: loop header
LB: loop body
LE: loop exit
PB: predicated region body
PF: predicated region fallthrough
CT: control target
= control target key end

     0   :  { %s2524_s11 = smov 0   ;;  %s2526_s12 = smov 0   ;;  %s3363_s0 = inlined_call_operand.<no memory space> [shape: f32[1], index: 0, kind: input, shape index: {}]   ;;  %s3364_s1 = inlined_call_operand.vmem [shape: f32[2,256,64], index: 1, kind: input, shape index: {}]   ;;  %s3365_s2 = inlined_call_operand.vmem [shape: f32[2,256,64], index: 2, kind: input, shape index: {}]   ;;  %s3366_s3 = inlined_call_operand.vmem [shape: f32[8,64], index: 3, kind: input, shape index: {}]   ;;  %s3367_s4 = inlined_call_operand.vmem [shape: f32[8,64], index: 4, kind: input, shape index: {}]   ;;  %s3368_s5 = inlined_call_operand.vmem [shape: f32[64,64], index: 5, kind: input, shape index: {}]   ;;  %s3369_s6 = inlined_call_operand.vmem [shape: f32[1,8], index: 6, kind: input, shape index: {}]   ;;  %s3370_s7 = inlined_call_operand.vmem [shape: f32[1,8], index: 7, kind: input, shape index: {}]   ;;  %s3371_s8 = inlined_call_operand.vmem [shape: f32[1,64], index: 8, kind: input, shape index: {}]   ;;  %s3372_s9 = inlined_call_operand.vmem [shape: f32[2,256,64], index: 9, kind: output, shape index: {}]  }
   0x1   :  { %14 = sst [smem:[#allocation5]] %s3363_s0  ;;  %s2528_s13 = smov 0  }
   0x2   :  { %s2530_s14 = smov 0   ;;  %s2532_s15 = smov 0  }
   0x3   :  { %s2534_s16 = smov 0   ;;  %s2536_s17 = smov 0  }
   0x4 LB: > { %s32_s0 = sadd.s32 1, %s2453_s14  ;;  %s35_s18 = sadd.s32 1, %s2457_s15  ;;  %s2465_s17 = sphi %s2536_s17, %s20_s17   ;;  %s2461_s16 = sphi %s2534_s16, %s3394_s16   ;;  %s2457_s15 = sphi %s2532_s15, %s3393_s15   ;;  %s2453_s14 = sphi %s2530_s14, %s3392_s14   ;;  %s2449_s13 = sphi %s2528_s13, %s3391_s13   ;;  %s2445_s12 = sphi %s2526_s12, %s3390_s12   ;;  %s2441_s11 = sphi %s2524_s11, %s3389_s11  }
   0x5   : > { %p33_p0 = scmp.ge.s32.totalorder %s32_s0, 2  ;;  %p2002_p1 = scmp.ge.s32.totalorder %s2465_s17, 1 }
   0x6   : > { %p333_p2 = scmp.lt.s32.totalorder %s2465_s17, 9  ;;  %s39_s19 = sadd.s32 1, %s2461_s16 }
   0x7   : > { %s3396_s0 = smov (%p33_p0, %s32_s0), 0  ;;  %s3398_s18 = smov (!%p33_p0, %s35_s18), %s2457_s15 }
   0x8   : > { %p334_p3 = pnand %p2002_p1, %p333_p2  ;;  %p37_p4 = scmp.ge.s32.totalorder %s3398_s18, 2 }
   0xa   : > { %s3400_s18 = smov (%p37_p4, %s3398_s18), 0  ;;  %s3402_s19 = smov (!%p37_p4, %s39_s19), %s2461_s16 }
   0xb   : > { %3377 = sst [smem:[#allocation6_spill]] %s3400_s18  ;;  %p41_p5 = scmp.ge.s32.totalorder %s3402_s19, 2 }
   0xc   : > { %337 = sbr.rel (%p334_p3) target bundleno = 1251 (0x4e3), region = 56 }
   0xd   : > { %s3404_s19 = smov (%p41_p5, %s3402_s19), 0 }
   0xe   : > { %3378 = sst [smem:[#allocation7_spill]] %s3404_s19 }
  0x13   : > { %s2003_s20 = sshll.u32 %s2445_s12, 4  ;;  %p387_p6 = scmp.lt.s32.totalorder %s2449_s13, 1 }
  0x14   : > { %p389_p7 = scmp.lt.s32.totalorder %s2003_s20, 31  ;;  %s2006_s21 = sshll.u32 %s2441_s11, 4 }
  0x15   : > { %s3406_s13 = smov (!%p387_p6, %s2449_s13), 1  ;;  %p399_p8 = scmp.lt.s32.totalorder %s2006_s21, 31 }
  0x16   : > { %s3408_s20 = smov (!%p389_p7, %s2003_s20), 31  ;;  %s2004_s22 = sshll.u32 %s3406_s13, 5 }
  0x17   : > { %s392_s23 = sadd.s32 %s2004_s22, %s3408_s20  ;;  %s3410_s21 = smov (!%p399_p8, %s2006_s21), 31 }
  0x18   : > { %s2005_s24 = sshll.u32 %s392_s23, 3  ;;  %s402_s10 = sadd.s32 %s2004_s22, %s3410_s21 }
  0x19   : > { %s2572_s27 = scalar_lea.vmem %s3364_s1, %s2005_s24  ;;  %s2577_s30 = scalar_lea.vmem %s3372_s9, %s2005_s24 }
  0x1a   : > { %s2008_s12 = sshll.u32 %s402_s10, 3  ;;  %p2012_p9 = scmp.ne.s32.totalorder %s2441_s11, 0 }
  0x1b   : > { %s2582_s13 = scalar_lea.vmem %s3365_s2, %s2008_s12  ;;  %vm421_vm0 = vcmask (!%p2012_p9), 7168   ;;  %vm454_vm1 = vcmask (!%p2012_p9), 523264   ;;  %v2467_v0 = vmov (!%p2012_p9), -inf   ;;  %v2468_v1 = vmov (!%p2012_p9), 0.0  }
  0x1c   : > { %420 = sbr.rel (%p2012_p9) target bundleno = 52 (0x34), region = 60  ;;  %422 = vst.msk [vmem:[#allocation3] sm:$0xff] (!%p2012_p9), %vm421_vm0, %v2467_v0  ;;  %423 = vst.msk [vmem:[#allocation3 + $0x8] sm:$0xff] (!%p2012_p9), %vm421_vm0, %v2467_v0 }
  0x1d   : > { %424 = vst.msk [vmem:[#allocation3 + $0x10] sm:$0xff] (!%p2012_p9), %vm421_vm0, %v2467_v0  ;;  %425 = vst.msk [vmem:[#allocation3 + $0x18] sm:$0xff] (!%p2012_p9), %vm421_vm0, %v2467_v0 }
  0x1e   : > { %426 = vst.msk [vmem:[#allocation3 + $0x20] sm:$0xff] (!%p2012_p9), %vm421_vm0, %v2467_v0  ;;  %427 = vst.msk [vmem:[#allocation3 + $0x28] sm:$0xff] (!%p2012_p9), %vm421_vm0, %v2467_v0 }
  0x1f   : > { %428 = vst.msk [vmem:[#allocation3 + $0x30] sm:$0xff] (!%p2012_p9), %vm421_vm0, %v2467_v0  ;;  %429 = vst.msk [vmem:[#allocation3 + $0x38] sm:$0xff] (!%p2012_p9), %vm421_vm0, %v2467_v0 }
  0x20   : > { %430 = vst.msk [vmem:[#allocation3 + $0x40] sm:$0xff] (!%p2012_p9), %vm421_vm0, %v2467_v0  ;;  %431 = vst.msk [vmem:[#allocation3 + $0x48] sm:$0xff] (!%p2012_p9), %vm421_vm0, %v2467_v0 }
  0x21   : > { %432 = vst.msk [vmem:[#allocation3 + $0x50] sm:$0xff] (!%p2012_p9), %vm421_vm0, %v2467_v0  ;;  %433 = vst.msk [vmem:[#allocation3 + $0x58] sm:$0xff] (!%p2012_p9), %vm421_vm0, %v2467_v0 }
  0x22   : > { %434 = vst.msk [vmem:[#allocation3 + $0x60] sm:$0xff] (!%p2012_p9), %vm421_vm0, %v2467_v0  ;;  %435 = vst.msk [vmem:[#allocation3 + $0x68] sm:$0xff] (!%p2012_p9), %vm421_vm0, %v2467_v0 }
  0x23   : > { %436 = vst.msk [vmem:[#allocation3 + $0x70] sm:$0xff] %vm421_vm0, %v2467_v0  ;;  %437 = vst.msk [vmem:[#allocation3 + $0x78] sm:$0xff] %vm421_vm0, %v2467_v0 }
  0x24   : > { %438 = vst.msk [vmem:[#allocation4] sm:$0xff] %vm421_vm0, %v2468_v1  ;;  %439 = vst.msk [vmem:[#allocation4 + $0x8] sm:$0xff] %vm421_vm0, %v2468_v1 }
  0x25   : > { %440 = vst.msk [vmem:[#allocation4 + $0x10] sm:$0xff] %vm421_vm0, %v2468_v1  ;;  %441 = vst.msk [vmem:[#allocation4 + $0x18] sm:$0xff] %vm421_vm0, %v2468_v1 }
  0x26   : > { %442 = vst.msk [vmem:[#allocation4 + $0x20] sm:$0xff] %vm421_vm0, %v2468_v1  ;;  %443 = vst.msk [vmem:[#allocation4 + $0x28] sm:$0xff] %vm421_vm0, %v2468_v1 }
  0x27   : > { %444 = vst.msk [vmem:[#allocation4 + $0x30] sm:$0xff] %vm421_vm0, %v2468_v1  ;;  %445 = vst.msk [vmem:[#allocation4 + $0x38] sm:$0xff] %vm421_vm0, %v2468_v1 }
  0x28   : > { %446 = vst.msk [vmem:[#allocation4 + $0x40] sm:$0xff] %vm421_vm0, %v2468_v1  ;;  %447 = vst.msk [vmem:[#allocation4 + $0x48] sm:$0xff] %vm421_vm0, %v2468_v1 }
  0x29   : > { %448 = vst.msk [vmem:[#allocation4 + $0x50] sm:$0xff] %vm421_vm0, %v2468_v1  ;;  %449 = vst.msk [vmem:[#allocation4 + $0x58] sm:$0xff] %vm421_vm0, %v2468_v1 }
  0x2a   : > { %450 = vst.msk [vmem:[#allocation4 + $0x60] sm:$0xff] %vm421_vm0, %v2468_v1  ;;  %451 = vst.msk [vmem:[#allocation4 + $0x68] sm:$0xff] %vm421_vm0, %v2468_v1 }
  0x2b   : > { %452 = vst.msk [vmem:[#allocation4 + $0x70] sm:$0xff] %vm421_vm0, %v2468_v1  ;;  %453 = vst.msk [vmem:[#allocation4 + $0x78] sm:$0xff] %vm421_vm0, %v2468_v1 }
  0x2c   : > { %455 = vst.msk [vmem:[#allocation2] sm:$0xff] %vm454_vm1, %v2468_v1  ;;  %456 = vst.msk [vmem:[#allocation2 + $0x8] sm:$0xff] %vm454_vm1, %v2468_v1 }
  0x2d   : > { %457 = vst.msk [vmem:[#allocation2 + $0x10] sm:$0xff] %vm454_vm1, %v2468_v1  ;;  %458 = vst.msk [vmem:[#allocation2 + $0x18] sm:$0xff] %vm454_vm1, %v2468_v1 }
  0x2e   : > { %459 = vst.msk [vmem:[#allocation2 + $0x20] sm:$0xff] %vm454_vm1, %v2468_v1  ;;  %460 = vst.msk [vmem:[#allocation2 + $0x28] sm:$0xff] %vm454_vm1, %v2468_v1 }
  0x2f   : > { %461 = vst.msk [vmem:[#allocation2 + $0x30] sm:$0xff] %vm454_vm1, %v2468_v1  ;;  %462 = vst.msk [vmem:[#allocation2 + $0x38] sm:$0xff] %vm454_vm1, %v2468_v1 }
  0x30   : > { %463 = vst.msk [vmem:[#allocation2 + $0x40] sm:$0xff] %vm454_vm1, %v2468_v1  ;;  %464 = vst.msk [vmem:[#allocation2 + $0x48] sm:$0xff] %vm454_vm1, %v2468_v1 }
  0x31   : > { %465 = vst.msk [vmem:[#allocation2 + $0x50] sm:$0xff] %vm454_vm1, %v2468_v1  ;;  %466 = vst.msk [vmem:[#allocation2 + $0x58] sm:$0xff] %vm454_vm1, %v2468_v1 }
  0x32   : > { %467 = vst.msk [vmem:[#allocation2 + $0x60] sm:$0xff] %vm454_vm1, %v2468_v1  ;;  %468 = vst.msk [vmem:[#allocation2 + $0x68] sm:$0xff] %vm454_vm1, %v2468_v1 }
  0x33   : > { %469 = vst.msk [vmem:[#allocation2 + $0x70] sm:$0xff] %vm454_vm1, %v2468_v1  ;;  %470 = vst.msk [vmem:[#allocation2 + $0x78] sm:$0xff] %vm454_vm1, %v2468_v1 }
  0x34 PF: > { %v521_v2 = vld [vmem:[%s3367_s4] sm:$0xff]  ;;  %vm542_vm2 = vcmask 523264   ;;  %v488_v4 = vld [vmem:[%s2582_s13 + $0x8] sm:$0xff]  ;;  %v489_v8 = vld [vmem:[%s2582_s13 + $0x10] sm:$0xff]  ;;  %vm930_vm3 = vcmask 64512   ;;  %vm1396_vm4 = vcmask 7168  }
  0x35   : > { %v487_v3 = vld [vmem:[%s2582_s13] sm:$0xff]  ;;  %v522_v5 = vpack.c.bf16 %v521_v2, %v521_v2  ;;  %v490_v9 = vld [vmem:[%s2582_s13 + $0x18] sm:$0xff]  ;;  %v492_v11 = vld [vmem:[%s2582_s13 + $0x28] sm:$0xff]  ;;  %p2048_p10 = scmp.ne.s32.totalorder %s2441_s11, 1 }
  0x36   : > { %v2638_v6 = vpack.c.bf16 %v488_v4, %v487_v3  ;;  %v491_v10 = vld [vmem:[%s2582_s13 + $0x20] sm:$0xff]  ;;  %v2655_v15 = vld [vmem:[%s2572_s27 + $0x8] sm:$0xff]  ;;  %v2657_v16 = vpack.c.bf16 %v490_v9, %v489_v8  ;;  %v2667_v20 = vld [vmem:[%s2572_s27 + $0x10] sm:$0xff]  ;;  %s1834_s11 = sld [smem:[#allocation5]] (!%p2048_p10) }
  0x37   : > { %2238 = vmatprep.subr.msk.bf16.mxu1 %vm542_vm2, %v522_v5  ;;  %v699_v7 = vsel %vm542_vm2, %v522_v5, 0  ;;  %v519_v12 = vld [vmem:[%s3366_s3] sm:$0xff]  ;;  %v2661_v18 = vpack.c.bf16 %v492_v11, %v491_v10  ;;  %v2670_v21 = vld [vmem:[%s2572_s27 + $0x18] sm:$0xff]  ;;  %v2676_v23 = vld [vmem:[%s2572_s27 + $0x28] sm:$0xff] }
  0x38   : > { %2133 = vmatprep.mubr.msk.bf16.mxu1 %vm542_vm2, %v2638_v6  ;;  %2132 = vmatpush3.bf16.xpose.msra.mxu1 %v699_v7  ;;  %v520_v13 = vpack.c.bf16 %v519_v12, %v519_v12  ;;  %v2652_v14 = vld [vmem:[%s2572_s27] sm:$0xff]  ;;  %v493_v24 = vld [vmem:[%s2582_s13 + $0x30] sm:$0xff]  ;;  %v494_v25 = vld [vmem:[%s2582_s13 + $0x38] sm:$0xff]  ;;  %v504_v26 = vpack.c.bf16 %v2670_v21, %v2667_v20 }
  0x39   : > { %v503_v17 = vpack.c.bf16 %v2655_v15, %v2652_v14  ;;  %v2673_v22 = vld [vmem:[%s2572_s27 + $0x20] sm:$0xff]  ;;  %v496_v28 = vld [vmem:[%s2582_s13 + $0x48] sm:$0xff]  ;;  %v2690_v30 = vpack.c.bf16 %v494_v25, %v493_v24  ;;  %v2697_v32 = vld [vmem:[%s2572_s27 + $0x30] sm:$0xff] }
  0x3a   : > { %2237 = vmatprep.subr.msk.bf16.mxu0 %vm542_vm2, %v520_v13  ;;  %v568_v19 = vsel %vm542_vm2, %v520_v13, 0  ;;  %v495_v27 = vld [vmem:[%s2582_s13 + $0x40] sm:$0xff]  ;;  %v505_v29 = vpack.c.bf16 %v2676_v23, %v2673_v22  ;;  %v2700_v33 = vld [vmem:[%s2572_s27 + $0x38] sm:$0xff]  ;;  %v2706_v35 = vld [vmem:[%s2572_s27 + $0x48] sm:$0xff] }
  0x3b   : > { %2114 = vmatpush3.bf16.xpose.msra.mxu0 %v568_v19  ;;  %2115 = vmatprep.mubr.msk.bf16.mxu0 %vm542_vm2, %v503_v17  ;;  %v2692_v31 = vpack.c.bf16 %v496_v28, %v495_v27  ;;  %v2703_v34 = vld [vmem:[%s2572_s27 + $0x40] sm:$0xff]  ;;  %v497_v36 = vld [vmem:[%s2582_s13 + $0x50] sm:$0xff]  ;;  %v498_v37 = vld [vmem:[%s2582_s13 + $0x58] sm:$0xff]  ;;  %v506_v38 = vpack.c.bf16 %v2700_v33, %v2697_v32 }
  0x3c   : > { %v499_v39 = vld [vmem:[%s2582_s13 + $0x60] sm:$0xff]  ;;  %v500_v40 = vld [vmem:[%s2582_s13 + $0x68] sm:$0xff]  ;;  %v507_v41 = vpack.c.bf16 %v2706_v35, %v2703_v34  ;;  %v2720_v42 = vpack.c.bf16 %v498_v37, %v497_v36  ;;  %v2727_v44 = vld [vmem:[%s2572_s27 + $0x50] sm:$0xff] }
  0x3d   : > { %v2722_v43 = vpack.c.bf16 %v500_v40, %v499_v39  ;;  %v2730_v45 = vld [vmem:[%s2572_s27 + $0x58] sm:$0xff]  ;;  %v2733_v46 = vld [vmem:[%s2572_s27 + $0x60] sm:$0xff]  ;;  %v2736_v47 = vld [vmem:[%s2572_s27 + $0x68] sm:$0xff] }
  0x3e   : > { %3379 = vst [vmem:[#allocation8_spill] sm:$0xff] %v2733_v46  ;;  %3380 = vst [vmem:[#allocation9_spill] sm:$0xff] %v2736_v47  ;;  %v501_v48 = vld [vmem:[%s2582_s13 + $0x70] sm:$0xff]  ;;  %v502_v49 = vld [vmem:[%s2582_s13 + $0x78] sm:$0xff]  ;;  %v508_v50 = vpack.c.bf16 %v2730_v45, %v2727_v44  ;;  %v509_v51 = vpack.c.bf16 %v2736_v47, %v2733_v46 }
  0x3f   : > { %2134 = vmatmul.mubr.msk.bf16.vlgmr.msra.gmra.mrb[0].mxu1 %vm542_vm2, %v2657_v16  ;;  %v2748_v52 = vpack.c.bf16 %v502_v49, %v501_v48  ;;  %v2753_v53 = vld [vmem:[%s2572_s27 + $0x70] sm:$0xff]  ;;  %v2756_v54 = vld [vmem:[%s2572_s27 + $0x78] sm:$0xff]  ;;  %v2768_v57 = vld [vmem:[%s3370_s7] ss:$0 sm:$0xff] }
  0x40   : > { %2137 = vmatprep.mubr.msk.bf16.mxu1 %vm542_vm2, %v2661_v18  ;;  %3381 = vst [vmem:[#allocation10_spill] sm:$0xff] %v2753_v53  ;;  %3382 = vst [vmem:[#allocation11_spill] sm:$0xff] %v2756_v54  ;;  %v510_v55 = vpack.c.bf16 %v2756_v54, %v2753_v53  ;;  %v2775_v63 = vld [vmem:[%s3369_s6] ss:$0 sm:$0xff]  ;;  %v1089_v54 = vld [vmem:[#allocation3 + $0x68] sm:$0xff] }
  0x42   : > { %2116 = vmatmul.mubr.msk.bf16.vlgmr.msra.gmra.mrb[0].mxu0 %vm542_vm2, %v504_v26 }
  0x43   : > { %2119 = vmatprep.mubr.msk.bf16.mxu0 %vm542_vm2, %v505_v29 }
  0x47   : > { %2138 = vmatmul.mubr.msk.bf16.gmra.mrb[4].mxu1 %vm542_vm2, %v2690_v30 }
  0x48   : > { %2141 = vmatprep.mubr.msk.bf16.mxu1 %vm542_vm2, %v2692_v31 }
  0x4a   : > { %2120 = vmatmul.mubr.msk.bf16.gmra.mrb[4].mxu0 %vm542_vm2, %v506_v38 }
  0x4b   : > { %2123 = vmatprep.mubr.msk.bf16.mxu0 %vm542_vm2, %v507_v41 }
  0x4f   : > { %2142 = vmatmul.mubr.msk.bf16.gmra.mrb[8].mxu1 %vm542_vm2, %v2720_v42 }
  0x50   : > { %2145 = vmatprep.mubr.msk.bf16.mxu1 %vm542_vm2, %v2722_v43 }
  0x52   : > { %2124 = vmatmul.mubr.msk.bf16.gmra.mrb[8].mxu0 %vm542_vm2, %v508_v50 }
  0x53   : > { %2127 = vmatprep.mubr.msk.bf16.mxu0 %vm542_vm2, %v509_v51 }
  0x57   : > { %2146 = vmatmul.mubr.msk.bf16.gmra.mrb[12].mxu1 %vm542_vm2, %v2748_v52 }
  0x5a   : > { %2128 = vmatmul.mubr.msk.bf16.gmra.mrb[12].mxu0 %vm542_vm2, %v510_v55 }
  0x5b   : > { %2157 = vmatprep.mubr.msk.bf16.mxu0 %vm542_vm2, %v2638_v6 }
 0x112   : > { %v2135_v56 = vpop.f32.mrb[0].mxu1 }
 0x113   : > { %v735_v58 = vpop.f32.mrb[1].mxu1  ;;  %v744_v60 = vadd.f32 %v2135_v56, %v2768_v57 }
 0x114   : > { %v2136_v59 = vpop.f32.mrb[2].mxu1  ;;  %v736_v0 = vadd.f32 %v2768_v57, %v735_v58 }
 0x115   : > { %v747_v61 = vadd.f32 %v2136_v59, %v2768_v57  ;;  %v738_v62 = vpop.f32.mrb[3].mxu1  ;;  %v2117_v3 = vpop.f32.mrb[0].mxu0 }
 0x116   : > { %v739_v1 = vadd.f32 %v2768_v57, %v738_v62  ;;  %v2780_v5 = vadd.f32 %v2117_v3, %v2775_v63  ;;  %v604_v6 = vpop.f32.mrb[1].mxu0 }
 0x117   : > { %v923_v2 = vpack.c.bf16 %v747_v61, %v744_v60  ;;  %v605_v7 = vadd.f32 %v2775_v63, %v604_v6  ;;  %v2118_v8 = vpop.f32.mrb[2].mxu0 }
 0x118   : > { %v922_v4 = vpack.c.bf16 %v739_v1, %v736_v0  ;;  %v2786_v11 = vadd.f32 %v2118_v8, %v2775_v63  ;;  %v607_v12 = vpop.f32.mrb[3].mxu0 }
 0x119   : > { %v608_v19 = vadd.f32 %v2775_v63, %v607_v12  ;;  %v959_v50 = vsel %vm930_vm3, %v923_v2, 0 }
 0x11a   : > { %2243 = vmatprep.subr.msk.bf16.mxu1 %vm930_vm3, %v922_v4  ;;  %v956_v9 = vsel %vm930_vm3, %v922_v4, 0  ;;  %v2139_v10 = vpop.f32.mrb[4].mxu1  ;;  %v915_v26 = vpack.c.bf16 %v2786_v11, %v2780_v5  ;;  %v524_v5 = vld [vmem:[%s3368_s5 + $0x8] sm:$0xff] }
 0x11b   : > { %2174 = vmatpush3.bf16.xpose.msra.mxu1 %v956_v9  ;;  %v760_v13 = vadd.f32 %v2139_v10, %v2768_v57  ;;  %v751_v17 = vpop.f32.mrb[5].mxu1  ;;  %v914_v29 = vpack.c.bf16 %v608_v19, %v605_v7 }
 0x11c   : > { %2244 = vmatprep.subr.msk.bf16.mxu1 %vm930_vm3, %v923_v2  ;;  %v752_v24 = vadd.f32 %v2768_v57, %v751_v17  ;;  %v2140_v25 = vpop.f32.mrb[6].mxu1 }
 0x11d   : > { %v763_v27 = vadd.f32 %v2140_v25, %v2768_v57  ;;  %v754_v28 = vpop.f32.mrb[7].mxu1  ;;  %v2121_v38 = vpop.f32.mrb[4].mxu0  ;;  %2189 = vmatprep.mubr.msk.bf16.mxu1 %vm930_vm3, %v914_v29 }
 0x11e   : > { %v755_v36 = vadd.f32 %v2768_v57, %v754_v28  ;;  %v2798_v40 = vadd.f32 %v2121_v38, %v2775_v63  ;;  %v620_v41 = vpop.f32.mrb[5].mxu0 }
 0x11f   : > { %v925_v37 = vpack.c.bf16 %v763_v27, %v760_v13  ;;  %v2801_v48 = vadd.f32 %v2775_v63, %v620_v41  ;;  %v2122_v49 = vpop.f32.mrb[6].mxu0 }
 0x120   : > { %v924_v39 = vpack.c.bf16 %v755_v36, %v752_v24  ;;  %v2805_v55 = vadd.f32 %v2122_v49, %v2775_v63  ;;  %v623_v56 = vpop.f32.mrb[7].mxu0 }
 0x121   : > { %v624_v60 = vadd.f32 %v2775_v63, %v623_v56 }
 0x122   : > { %v2143_v51 = vpop.f32.mrb[8].mxu1  ;;  %v917_v0 = vpack.c.bf16 %v2805_v55, %v2798_v40  ;;  %v962_v17 = vsel %vm930_vm3, %v924_v39, 0 }
 0x123   : > { %2176 = vmatpush3.bf16.xpose.msra.mxu1 %v959_v50  ;;  %v776_v58 = vadd.f32 %v2143_v51, %v2768_v57  ;;  %v767_v59 = vpop.f32.mrb[9].mxu1  ;;  %v916_v3 = vpack.c.bf16 %v624_v60, %v2801_v48 }
 0x124   : > { %2245 = vmatprep.subr.msk.bf16.mxu1 %vm930_vm3, %v924_v39  ;;  %v768_v61 = vadd.f32 %v2768_v57, %v767_v59  ;;  %v2144_v62 = vpop.f32.mrb[10].mxu1 }
 0x125   : > { %v779_v1 = vadd.f32 %v2144_v62, %v2768_v57  ;;  %v770_v2 = vpop.f32.mrb[11].mxu1  ;;  %v2125_v7 = vpop.f32.mrb[8].mxu0 }
 0x126   : > { %v771_v4 = vadd.f32 %v2768_v57, %v770_v2  ;;  %v645_v9 = vadd.f32 %v2125_v7, %v2775_v63  ;;  %v636_v10 = vpop.f32.mrb[9].mxu0 }
 0x127   : > { %v927_v6 = vpack.c.bf16 %v779_v1, %v776_v58  ;;  %v637_v12 = vadd.f32 %v2775_v63, %v636_v10  ;;  %v2126_v13 = vpop.f32.mrb[10].mxu0 }
 0x128   : > { %v926_v8 = vpack.c.bf16 %v771_v4, %v768_v61  ;;  %v648_v24 = vadd.f32 %v2126_v13, %v2775_v63  ;;  %v639_v25 = vpop.f32.mrb[11].mxu0  ;;  %v965_v61 = vsel %vm930_vm3, %v925_v37, 0  ;;  %v528_v13 = vld [vmem:[%s3368_s5 + $0x28] sm:$0xff] }
 0x129   : > { %v640_v29 = vadd.f32 %v2775_v63, %v639_v25 }
 0x12a   : > { %v2147_v19 = vpop.f32.mrb[12].mxu1  ;;  %v919_v40 = vpack.c.bf16 %v648_v24, %v645_v9  ;;  %v968_v7 = vsel %vm930_vm3, %v926_v8, 0  ;;  %v971_v9 = vsel %vm930_vm3, %v927_v6, 0  ;;  %v530_v24 = vld [vmem:[%s3368_s5 + $0x38] sm:$0xff] }
 0x12b   : > { %2178 = vmatpush3.bf16.xpose.msra.mxu1 %v962_v17  ;;  %v792_v27 = vadd.f32 %v2147_v19, %v2768_v57  ;;  %v783_v28 = vpop.f32.mrb[13].mxu1  ;;  %v918_v39 = vpack.c.bf16 %v640_v29, %v637_v12  ;;  %v527_v12 = vld [vmem:[%s3368_s5 + $0x20] sm:$0xff]  ;;  %v529_v19 = vld [vmem:[%s3368_s5 + $0x30] sm:$0xff] }
 0x12c   : > { %2246 = vmatprep.subr.msk.bf16.mxu1 %vm930_vm3, %v925_v37  ;;  %v784_v36 = vadd.f32 %v2768_v57, %v783_v28  ;;  %v2148_v38 = vpop.f32.mrb[14].mxu1  ;;  %v533_v17 = vpack.c.bf16 %v528_v13, %v527_v12 }
 0x12d   : > { %v795_v41 = vadd.f32 %v2148_v38, %v2768_v57  ;;  %v786_v48 = vpop.f32.mrb[15].mxu1  ;;  %v2129_v51 = vpop.f32.mrb[12].mxu0  ;;  %v2469_v38 = vmov 0  }
 0x12e   : > { %v787_v49 = vadd.f32 %v2768_v57, %v786_v48  ;;  %v661_v56 = vadd.f32 %v2129_v51, %v2775_v63  ;;  %v652_v58 = vpop.f32.mrb[13].mxu0  ;;  %v812_v25 = vsel %vm542_vm2, %v533_v17, 0  ;;  %2312 = vset.pattern.permute.xlu1 %v2469_v38  ;;  %2311 = vset.pattern.permute.xlu0 %v2469_v38 }
 0x12f   : > { %v929_v50 = vpack.c.bf16 %v795_v41, %v792_v27  ;;  %v653_v59 = vadd.f32 %v2775_v63, %v652_v58  ;;  %v2130_v60 = vpop.f32.mrb[14].mxu0  ;;  %v534_v27 = vpack.c.bf16 %v530_v24, %v529_v19  ;;  %v2971_v24 = vld [vmem:[#allocation3 + $0x8] sm:$0xff] }
 0x130   : > { %v928_v55 = vpack.c.bf16 %v787_v49, %v784_v36  ;;  %v664_v62 = vadd.f32 %v2130_v60, %v2775_v63  ;;  %v655_v1 = vpop.f32.mrb[15].mxu0 }
 0x131   : > { %v656_v2 = vadd.f32 %v2775_v63, %v655_v1  ;;  %v977_v63 = vsel %vm930_vm3, %v929_v50, 0  ;;  %v815_v28 = vsel %vm542_vm2, %v534_v27, 0 }
 0x132   : > { %v921_v57 = vpack.c.bf16 %v664_v62, %v661_v56  ;;  %v974_v37 = vsel %vm930_vm3, %v928_v55, 0 }
 0x133   : > { %2180 = vmatpush3.bf16.xpose.msra.mxu1 %v965_v61  ;;  %v920_v4 = vpack.c.bf16 %v656_v2, %v653_v59 }
 0x134   : > { %2247 = vmatprep.subr.msk.bf16.mxu1 %vm930_vm3, %v926_v8 }
 0x13b   : > { %2182 = vmatpush3.bf16.xpose.msra.mxu1 %v968_v7 }
 0x13c   : > { %2248 = vmatprep.subr.msk.bf16.mxu1 %vm930_vm3, %v927_v6  ;;  %v523_v6 = vld [vmem:[%s3368_s5] sm:$0xff] }
 0x13d   : > { %v531_v11 = vpack.c.bf16 %v524_v5, %v523_v6  ;;  %v2955_v6 = vld [vmem:[#allocation3] sm:$0xff] }
 0x13f   : > { %2239 = vmatprep.subr.msk.bf16.mxu0 %vm542_vm2, %v531_v11 }
 0x143   : > { %2184 = vmatpush3.bf16.xpose.msra.mxu1 %v971_v9  ;;  %v2952_v9 = vld [vmem:[#allocation3 + $0x10] sm:$0xff] }
 0x144   : > { %2249 = vmatprep.subr.msk.bf16.mxu1 %vm930_vm3, %v928_v55  ;;  %v2946_v55 = vld [vmem:[%s3371_s8] ss:$0 sm:$0xff] }
 0x14b   : > { %2186 = vmatpush3.bf16.xpose.msra.mxu1 %v974_v37 }
 0x14c   : > { %2250 = vmatprep.subr.msk.bf16.mxu1 %vm930_vm3, %v929_v50 }
 0x153   : > { %2188 = vmatpush3.bf16.xpose.msra.mxu1 %v977_v63 }
 0x15a   : > { %2190 = vmatmul.mubr.msk.bf16.vlgmr.msra.gmra.mrb[16].mxu1 %vm930_vm3, %v915_v26  ;;  %v806_v26 = vsel %vm542_vm2, %v531_v11, 0 }
 0x15b   : > { %2193 = vmatprep.mubr.msk.bf16.mxu1 %vm930_vm3, %v916_v3  ;;  %2150 = vmatpush3.bf16.xpose.msra.mxu0 %v806_v26  ;;  %v526_v3 = vld [vmem:[%s3368_s5 + $0x18] sm:$0xff] }
 0x162   : > { %2194 = vmatmul.mubr.msk.bf16.gmra.mrb[20].mxu1 %vm930_vm3, %v917_v0  ;;  %v525_v0 = vld [vmem:[%s3368_s5 + $0x10] sm:$0xff] }
 0x163   : > { %2197 = vmatprep.mubr.msk.bf16.mxu1 %vm930_vm3, %v918_v39  ;;  %v532_v8 = vpack.c.bf16 %v526_v3, %v525_v0 }
 0x165   : > { %2240 = vmatprep.subr.msk.bf16.mxu0 %vm542_vm2, %v532_v8  ;;  %v809_v10 = vsel %vm542_vm2, %v532_v8, 0 }
 0x166   : > { %2152 = vmatpush3.bf16.xpose.msra.mxu0 %v809_v10 }
 0x167   : > { %2241 = vmatprep.subr.msk.bf16.mxu0 %vm542_vm2, %v533_v17  ;;  %v2966_v17 = vld [vmem:[#allocation3 + $0x18] sm:$0xff] }
 0x16a   : > { %2198 = vmatmul.mubr.msk.bf16.gmra.mrb[24].mxu1 %vm930_vm3, %v919_v40 }
 0x16b   : > { %2201 = vmatprep.mubr.msk.bf16.mxu1 %vm930_vm3, %v920_v4 }
 0x16e   : > { %2154 = vmatpush3.bf16.xpose.msra.mxu0 %v812_v25 }
 0x16f   : > { %2242 = vmatprep.subr.msk.bf16.mxu0 %vm542_vm2, %v534_v27 }
 0x172   : > { %2202 = vmatmul.mubr.msk.bf16.gmra.mrb[28].mxu1 %vm930_vm3, %v921_v57 }
 0x176   : > { %2156 = vmatpush3.bf16.xpose.msra.mxu0 %v815_v28 }
 0x17d   : > { %2158 = vmatmul.mubr.msk.bf16.vlgmr.msra.gmra.mrb[16].mxu0 %vm542_vm2, %v2657_v16 }
 0x17e   : > { %2161 = vmatprep.mubr.msk.bf16.mxu0 %vm542_vm2, %v2661_v18 }
 0x185   : > { %2162 = vmatmul.mubr.msk.bf16.gmra.mrb[20].mxu0 %vm542_vm2, %v2690_v30 }
 0x186   : > { %2165 = vmatprep.mubr.msk.bf16.mxu0 %vm542_vm2, %v2692_v31 }
 0x18d   : > { %2166 = vmatmul.mubr.msk.bf16.gmra.mrb[24].mxu0 %vm542_vm2, %v2720_v42 }
 0x18e   : > { %2169 = vmatprep.mubr.msk.bf16.mxu0 %vm542_vm2, %v2722_v43 }
 0x195   : > { %2170 = vmatmul.mubr.msk.bf16.gmra.mrb[28].mxu0 %vm542_vm2, %v2748_v52 }
 0x22d   : > { %v2895_v29 = vpop.f32.mrb[16].mxu1 }
 0x22e   : > { %1096 = vmax.xlane.f32.xlu1 %v2895_v29  ;;  %v2898_v16 = vpop.f32.mrb[17].mxu1 }
 0x22f   : > { %1092 = vmax.xlane.f32.xlu0 %v2898_v16  ;;  %v2901_v18 = vpop.f32.mrb[18].mxu1 }
 0x230   : > { %v2903_v30 = vpop.f32.mrb[19].mxu1 }
 0x232   : > { %1098 = vmax.xlane.f32.xlu1 %v2901_v18 }
 0x233   : > { %1094 = vmax.xlane.f32.xlu0 %v2903_v30 }
 0x235   : > { %v2907_v31 = vpop.f32.mrb[20].mxu1 }
 0x236   : > { %v2909_v42 = vpop.f32.mrb[21].mxu1 }
 0x237   : > { %1100 = vmax.xlane.f32.xlu0 %v2909_v42  ;;  %v2912_v43 = vpop.f32.mrb[22].mxu1 }
 0x238   : > { %1106 = vmax.xlane.f32.xlu1 %v2912_v43  ;;  %v2915_v52 = vpop.f32.mrb[23].mxu1 }
 0x23b   : > { %1104 = vmax.xlane.f32.xlu0 %v2907_v31 }
 0x23c   : > { %1102 = vmax.xlane.f32.xlu1 %v2915_v52 }
 0x23d   : > { %v2919_v36 = vpop.f32.mrb[24].mxu1 }
 0x23e   : > { %v2921_v40 = vpop.f32.mrb[25].mxu1 }
 0x23f   : > { %1108 = vmax.xlane.f32.xlu0 %v2921_v40  ;;  %v2924_v41 = vpop.f32.mrb[26].mxu1 }
 0x240   : > { %1114 = vmax.xlane.f32.xlu1 %v2924_v41  ;;  %v2927_v48 = vpop.f32.mrb[27].mxu1 }
 0x243   : > { %1112 = vmax.xlane.f32.xlu0 %v2919_v36 }
 0x244   : > { %1110 = vmax.xlane.f32.xlu1 %v2927_v48 }
 0x245   : > { %v2931_v39 = vpop.f32.mrb[28].mxu1 }
 0x246   : > { %v2933_v49 = vpop.f32.mrb[29].mxu1 }
 0x247   : > { %1116 = vmax.xlane.f32.xlu0 %v2933_v49  ;;  %v2936_v50 = vpop.f32.mrb[30].mxu1 }
 0x248   : > { %1122 = vmax.xlane.f32.xlu1 %v2936_v50  ;;  %v2939_v51 = vpop.f32.mrb[31].mxu1 }
 0x24b   : > { %1120 = vmax.xlane.f32.xlu0 %v2931_v39 }
 0x24c   : > { %1118 = vmax.xlane.f32.xlu1 %v2939_v51 }
 0x250   : > { %v2159_v56 = vpop.f32.mrb[16].mxu0 }
 0x251   : > { %v860_v58 = vadd.f32 %v2159_v56, %v2946_v55  ;;  %v851_v59 = vpop.f32.mrb[17].mxu0 }
 0x252   : > { %v852_v60 = vadd.f32 %v2946_v55, %v851_v59  ;;  %v2160_v61 = vpop.f32.mrb[18].mxu0 }
 0x253   : > { %v863_v62 = vadd.f32 %v2160_v61, %v2946_v55  ;;  %v854_v1 = vpop.f32.mrb[19].mxu0 }
 0x254   : > { %v855_v2 = vadd.f32 %v2946_v55, %v854_v1 }
 0x255   : > { %v1534_v57 = vpack.c.bf16 %v863_v62, %v860_v58  ;;  %v2989_v62 = vld [vmem:[#allocation3 + $0x38] sm:$0xff] }
 0x256   : > { %v1533_v4 = vpack.c.bf16 %v855_v2, %v852_v60  ;;  %v2985_v60 = vld [vmem:[#allocation3 + $0x20] sm:$0xff] }
 0x258   : > { %v2163_v7 = vpop.f32.mrb[20].mxu0  ;;  %2205 = vmatprep.subr.bf16.mxu0 %v1533_v4 }
 0x259   : > { %v876_v37 = vadd.f32 %v2163_v7, %v2946_v55  ;;  %v867_v63 = vpop.f32.mrb[21].mxu0  ;;  %2206 = vmatpush3.bf16.msra.mxu0 %v1533_v4 }
 0x25a   : > { %v868_v5 = vadd.f32 %v2946_v55, %v867_v63  ;;  %v2164_v11 = vpop.f32.mrb[22].mxu0  ;;  %2207 = vmatprep.subr.bf16.mxu0 %v1534_v57 }
 0x25b   : > { %v879_v0 = vadd.f32 %v2164_v11, %v2946_v55  ;;  %v870_v3 = vpop.f32.mrb[23].mxu0 }
 0x25c   : > { %v871_v12 = vadd.f32 %v2946_v55, %v870_v3 }
 0x25d   : > { %v1536_v19 = vpack.c.bf16 %v879_v0, %v876_v37  ;;  %2208 = vmatpush3.bf16.msra.mxu0 %v1534_v57 }
 0x25e   : > { %v1535_v25 = vpack.c.bf16 %v871_v12, %v868_v5 }
 0x260   : > { %v2167_v56 = vpop.f32.mrb[24].mxu0  ;;  %2209 = vmatprep.subr.bf16.mxu0 %v1535_v25 }
 0x261   : > { %v883_v59 = vpop.f32.mrb[25].mxu0  ;;  %2210 = vmatpush3.bf16.msra.mxu0 %v1535_v25  ;;  %v892_v1 = vadd.f32 %v2167_v56, %v2946_v55 }
 0x262   : > { %v2168_v61 = vpop.f32.mrb[26].mxu0  ;;  %2211 = vmatprep.subr.bf16.mxu0 %v1536_v19  ;;  %v884_v2 = vadd.f32 %v2946_v55, %v883_v59  ;;  %v3016_v59 = vld [vmem:[#allocation3 + $0x40] sm:$0xff] }
 0x263   : > { %v886_v57 = vpop.f32.mrb[27].mxu0  ;;  %v895_v7 = vadd.f32 %v2168_v61, %v2946_v55 }
 0x264   : > { %v887_v37 = vadd.f32 %v2946_v55, %v886_v57  ;;  %v3023_v57 = vld [vmem:[#allocation3 + $0x58] sm:$0xff] }
 0x265   : > { %2212 = vmatpush3.bf16.msra.mxu0 %v1536_v19  ;;  %v1538_v0 = vpack.c.bf16 %v895_v7, %v892_v1 }
 0x266   : > { %v1537_v3 = vpack.c.bf16 %v887_v37, %v884_v2 }
 0x268   : > { %v2171_v25 = vpop.f32.mrb[28].mxu0  ;;  %2213 = vmatprep.subr.bf16.mxu0 %v1537_v3 }
 0x269   : > { %2214 = vmatpush3.bf16.msra.mxu0 %v1537_v3  ;;  %v908_v61 = vadd.f32 %v2171_v25, %v2946_v55 }
 0x26a   : > { %2215 = vmatprep.subr.bf16.mxu0 %v1538_v0 }
 0x26d   : > { %2216 = vmatpush3.bf16.msra.mxu0 %v1538_v0 }
 0x2bb   : > { %v1097_v26 = vpop.xlane.xlu1 %1096 }
 0x2bc   : > { %v2960_v8 = vmax.f32 %v2952_v9, %v1097_v26  ;;  %v1093_v10 = vpop.xlane.xlu0 %1092  ;;  %v3002_v26 = vld [vmem:[#allocation3 + $0x30] sm:$0xff] }
 0x2bd   : > { %v2964_v13 = vmax.f32 %v2955_v6, %v1093_v10  ;;  %v3006_v10 = vld [vmem:[#allocation3 + $0x28] sm:$0xff] }
 0x2be   : > { %1672 = vst.msk [vmem:[#allocation3 + $0x10] sm:$0xff] %vm1396_vm4, %v2960_v8  ;;  %1200 = vperm.xlu1 %2312, %v2960_v8  }
 0x2bf   : > { %1670 = vst.msk [vmem:[#allocation3] sm:$0xff] %vm1396_vm4, %v2964_v13  ;;  %v1099_v27 = vpop.xlane.xlu1 %1098  ;;  %1190 = vperm.xlu0 %2311, %v2964_v13   ;;  %v1140_v0 = vsub.f32 %v2955_v6, %v2964_v13 }
 0x2c0   : > { %v2977_v28 = vmax.f32 %v2966_v17, %v1099_v27  ;;  %v1095_v38 = vpop.xlane.xlu0 %1094 }
 0x2c1   : > { %v2980_v58 = vmax.f32 %v2971_v24, %v1095_v38  ;;  %v899_v38 = vpop.f32.mrb[29].mxu0 }
 0x2c2   : > { %1673 = vst.msk [vmem:[#allocation3 + $0x18] sm:$0xff] %vm1396_vm4, %v2977_v28  ;;  %1205 = vperm.xlu1 %2312, %v2977_v28   ;;  %v900_v1 = vadd.f32 %v2946_v55, %v899_v38  ;;  %v2172_v2 = vpop.f32.mrb[30].mxu0  ;;  %v3035_v38 = vld [vmem:[#allocation3 + $0x50] sm:$0xff]  ;;  %v1143_v13 = vsub.f32 %v2966_v17, %v2977_v28 }
 0x2c3   : > { %1671 = vst.msk [vmem:[#allocation3 + $0x8] sm:$0xff] %vm1396_vm4, %v2980_v58  ;;  %v902_v7 = vpop.f32.mrb[31].mxu0 }
 0x2c4   : > { %v1101_v4 = vpop.xlane.xlu0 %1100 }
 0x2c5   : > { %v2996_v63 = vmax.f32 %v2985_v60, %v1101_v4  ;;  %v1107_v5 = vpop.xlane.xlu1 %1106  ;;  %v911_v4 = vadd.f32 %v2172_v2, %v2946_v55  ;;  %v3040_v2 = vld [vmem:[#allocation3 + $0x48] sm:$0xff] }
 0x2c6   : > { %v2999_v11 = vmax.f32 %v2989_v62, %v1107_v5  ;;  %1195 = vperm.xlu1 %2312, %v2980_v58   ;;  %v903_v5 = vadd.f32 %v2946_v55, %v902_v7  ;;  %v3052_v7 = vld [vmem:[#allocation3 + $0x60] sm:$0xff] }
 0x2c7   : > { %1674 = vst.msk [vmem:[#allocation3 + $0x20] sm:$0xff] %vm1396_vm4, %v2996_v63  ;;  %v1540_v25 = vpack.c.bf16 %v911_v4, %v908_v61 }
 0x2c8   : > { %1677 = vst.msk [vmem:[#allocation3 + $0x38] sm:$0xff] %vm1396_vm4, %v2999_v11  ;;  %v1105_v12 = vpop.xlane.xlu0 %1104  ;;  %v1539_v53 = vpack.c.bf16 %v903_v5, %v900_v1 }
 0x2c9   : > { %v3011_v19 = vmax.f32 %v3002_v26, %v1105_v12  ;;  %v1103_v27 = vpop.xlane.xlu1 %1102 }
 0x2ca   : > { %v3014_v56 = vmax.f32 %v3006_v10, %v1103_v27  ;;  %2217 = vmatprep.subr.bf16.mxu0 %v1539_v53 }
 0x2cb   : > { %1676 = vst.msk [vmem:[#allocation3 + $0x30] sm:$0xff] %vm1396_vm4, %v3011_v19  ;;  %1220 = vperm.xlu1 %2312, %v3011_v19   ;;  %2218 = vmatpush3.bf16.msra.mxu0 %v1539_v53  ;;  %v1156_v53 = vmul.f32 1.442695, %v1140_v0  ;;  %v1141_v0 = vsub.f32 %v2971_v24, %v2980_v58  ;;  %v1142_v58 = vsub.f32 %v2952_v9, %v2960_v8 }
 0x2cc   : > { %1675 = vst.msk [vmem:[#allocation3 + $0x28] sm:$0xff] %vm1396_vm4, %v3014_v56  ;;  %v1109_v37 = vpop.xlane.xlu0 %1108  ;;  %2219 = vmatprep.subr.bf16.mxu0 %v1540_v25 }
 0x2cd   : > { %v3030_v3 = vmax.f32 %v3016_v59, %v1109_v37  ;;  %v1115_v12 = vpop.xlane.xlu1 %1114  ;;  %v3057_v37 = vld [vmem:[#allocation3 + $0x78] sm:$0xff]  ;;  %2313 = vpow2.f32 %v1156_v53  ;;  %v1158_v53 = vmul.f32 1.442695, %v1141_v0 }
 0x2ce   : > { %v3033_v27 = vmax.f32 %v3023_v57, %v1115_v12 }
 0x2cf   : > { %1678 = vst.msk [vmem:[#allocation3 + $0x40] sm:$0xff] %vm1396_vm4, %v3030_v3  ;;  %1210 = vperm.xlu1 %2312, %v2996_v63   ;;  %2220 = vmatpush3.bf16.msra.mxu0 %v1540_v25  ;;  %v1162_v25 = vmul.f32 1.442695, %v1143_v13  ;;  %v1144_v13 = vsub.f32 %v2985_v60, %v2996_v63 }
 0x2d0   : > { %1681 = vst.msk [vmem:[#allocation3 + $0x58] sm:$0xff] %vm1396_vm4, %v3033_v27  ;;  %v1113_v55 = vpop.xlane.xlu0 %1112  ;;  %v1151_v9 = vsub.f32 %v3023_v57, %v3033_v27 }
 0x2d1   : > { %v3047_v61 = vmax.f32 %v3035_v38, %v1113_v55  ;;  %v1111_v4 = vpop.xlane.xlu1 %1110  ;;  %2315 = vpow2.f32 %v1162_v25 }
 0x2d2   : > { %v3050_v1 = vmax.f32 %v3040_v2, %v1111_v4  ;;  %v3070_v4 = vld [vmem:[#allocation3 + $0x70] sm:$0xff]  ;;  %2317 = vpow2.f32 %v1158_v53  ;;  %v1178_v60 = vmul.f32 1.442695, %v1151_v9 }
 0x2d3   : > { %1680 = vst.msk [vmem:[#allocation3 + $0x50] sm:$0xff] %vm1396_vm4, %v3047_v61  ;;  %1215 = vperm.xlu1 %2312, %v3014_v56  }
 0x2d4   : > { %1679 = vst.msk [vmem:[#allocation3 + $0x48] sm:$0xff] %vm1396_vm4, %v3050_v1  ;;  %1235 = vperm.xlu0 %2311, %v3050_v1   ;;  %v1117_v6 = vpop.xlane.xlu0 %1116  ;;  %v1149_v63 = vsub.f32 %v3040_v2, %v3050_v1  ;;  %v1148_v2 = vsub.f32 %v3016_v59, %v3030_v3 }
 0x2d5   : > { %v3065_v5 = vmax.f32 %v3052_v7, %v1117_v6  ;;  %v1123_v12 = vpop.xlane.xlu1 %1122  ;;  %v1145_v6 = vsub.f32 %v3006_v10, %v3014_v56  ;;  %v1147_v10 = vsub.f32 %v2989_v62, %v2999_v11  ;;  %v1160_v56 = vmul.f32 1.442695, %v1142_v58 }
 0x2d6   : > { %v3068_v55 = vmax.f32 %v3057_v37, %v1123_v12  ;;  %v1164_v62 = vmul.f32 1.442695, %v1144_v13 }
 0x2d7   : > { %1682 = vst.msk [vmem:[#allocation3 + $0x60] sm:$0xff] %vm1396_vm4, %v3065_v5  ;;  %1225 = vperm.xlu1 %2312, %v2999_v11   ;;  %v3103_v8 = vpop.eup %2313  ;;  %v1146_v11 = vsub.f32 %v3002_v26, %v3011_v19  ;;  %v1174_v26 = vmul.f32 1.442695, %v1149_v63 }
 0x2d8   : > { %v1155_v17 = vsub.f32 %v3057_v37, %v3068_v55  ;;  %1685 = vst.msk [vmem:[#allocation3 + $0x78] sm:$0xff] %vm1396_vm4, %v3068_v55  ;;  %1245 = vperm.xlu0 %2311, %v3033_v27   ;;  %v1121_v28 = vpop.xlane.xlu0 %1120  ;;  %v1150_v27 = vsub.f32 %v3035_v38, %v3047_v61 }
 0x2d9   : > { %v3085_v12 = vmax.f32 %v3070_v4, %v1121_v28  ;;  %v1119_v46 = vpop.xlane.xlu1 %1118  ;;  %v1170_v28 = vmul.f32 1.442695, %v1147_v10  ;;  %v1168_v57 = vmul.f32 1.442695, %v1146_v11 }
 0x2da   : > { %v1137_v47 = vmax.f32 %v1089_v54, %v1119_v46  ;;  %v1166_v46 = vmul.f32 1.442695, %v1145_v6  ;;  %v1176_v1 = vmul.f32 1.442695, %v1150_v27 }
 0x2db   : > { %v1154_v24 = vsub.f32 %v3070_v4, %v3085_v12  ;;  %1684 = vst.msk [vmem:[#allocation3 + $0x70] sm:$0xff] %vm1396_vm4, %v3085_v12  ;;  %1230 = vperm.xlu1 %2312, %v3030_v3   ;;  %v3111_v0 = vpop.eup %2315 }
 0x2dc   : > { %1683 = vst.msk [vmem:[#allocation3 + $0x68] sm:$0xff] %vm1396_vm4, %v1137_v47  ;;  %1255 = vperm.xlu0 %2311, %v1137_v47   ;;  %2319 = vpow2.f32 %v1166_v46  ;;  %v1153_v19 = vsub.f32 %v1089_v54, %v1137_v47  ;;  %v3117_v25 = vpop.eup %2317  ;;  %v1172_v47 = vmul.f32 1.442695, %v1148_v2  ;;  %v1152_v54 = vsub.f32 %v3052_v7, %v3065_v5 }
 0x2dd   : > { %2321 = vpow2.f32 %v1160_v56 }
 0x2de   : > { %2323 = vpow2.f32 %v1170_v28  ;;  %v1182_v38 = vmul.f32 1.442695, %v1153_v19  ;;  %v1180_v53 = vmul.f32 1.442695, %v1152_v54 }
 0x2df   : > { %1240 = vperm.xlu1 %2312, %v3047_v61   ;;  %2325 = vpow2.f32 %v1164_v62 }
 0x2e0   : > { %1265 = vperm.xlu0 %2311, %v3068_v55   ;;  %2327 = vpow2.f32 %v1178_v60 }
 0x2e1   : > { %2329 = vpow2.f32 %v1168_v57 }
 0x2e2   : > { %2331 = vpow2.f32 %v1174_v26 }
 0x2e3   : > { %1250 = vperm.xlu1 %2312, %v3065_v5   ;;  %2333 = vpow2.f32 %v1176_v1 }
 0x2e4   : > { %1431 = vperm.xlu0 %2311, %v3103_v8   ;;  %2335 = vpow2.f32 %v1182_v38 }
 0x2e5   : > { %2337 = vpow2.f32 %v1172_v47 }
 0x2e6   : > { %v3119_v6 = vpop.eup %2319  ;;  %2339 = vpow2.f32 %v1180_v53 }
 0x2e7   : > { %1260 = vperm.xlu1 %2312, %v3085_v12   ;;  %v3125_v61 = vpop.eup %2321 }
 0x2e8   : > { %1446 = vperm.xlu0 %2311, %v3111_v0   ;;  %v3127_v58 = vpop.eup %2323 }
 0x2e9   : > { %v3133_v59 = vpop.eup %2325 }
 0x2ea   : > { %v3135_v3 = vpop.eup %2327 }
 0x2eb   : > { %1436 = vperm.xlu1 %2312, %v3117_v25   ;;  %v3139_v10 = vpop.eup %2329 }
 0x2ec   : > { %1456 = vperm.xlu0 %2311, %v3119_v6   ;;  %v3141_v46 = vpop.eup %2331 }
 0x2ed   : > { %v3145_v7 = vpop.eup %2333 }
 0x2ee   : > { %v3147_v5 = vpop.eup %2335 }
 0x2ef   : > { %1441 = vperm.xlu1 %2312, %v3125_v61   ;;  %v3151_v56 = vpop.eup %2337 }
 0x2f0   : > { %1466 = vperm.xlu0 %2311, %v3127_v58   ;;  %v3154_v13 = vpop.eup %2339 }
 0x2f3   : > { %1451 = vperm.xlu1 %2312, %v3133_v59  }
 0x2f4   : > { %1486 = vperm.xlu0 %2311, %v3135_v3  }
 0x2f7   : > { %1461 = vperm.xlu1 %2312, %v3139_v10  }
 0x2f8   : > { %1476 = vperm.xlu0 %2311, %v3141_v46  }
 0x2fb   : > { %1481 = vperm.xlu1 %2312, %v3145_v7  }
 0x2fc   : > { %1496 = vperm.xlu0 %2311, %v3147_v5  }
 0x2ff   : > { %1471 = vperm.xlu1 %2312, %v3151_v56  }
 0x303   : > { %1491 = vperm.xlu1 %2312, %v3154_v13  }
 0x33d   : > { %v1201_v28 = vpop.permute.xlu1 %1200 }
 0x33e   : > { %v1270_v9 = vsub.f32 %v2895_v29, %v1201_v28  ;;  %v1191_v62 = vpop.permute.xlu0 %1190 }
 0x33f   : > { %v1268_v11 = vsub.f32 %v2898_v16, %v1191_v62 }
 0x340   : > { %v1288_v60 = vmul.f32 1.442695, %v1270_v9 }
 0x341   : > { %v1284_v63 = vmul.f32 1.442695, %v1268_v11  ;;  %v1206_v57 = vpop.permute.xlu1 %1205 }
 0x342   : > { %2341 = vpow2.f32 %v1288_v60  ;;  %v1271_v27 = vsub.f32 %v2901_v18, %v1206_v57 }
 0x343   : > { %2343 = vpow2.f32 %v1284_v63 }
 0x344   : > { %v1290_v26 = vmul.f32 1.442695, %v1271_v27 }
 0x345   : > { %v1196_v19 = vpop.permute.xlu1 %1195 }
 0x346   : > { %2345 = vpow2.f32 %v1290_v26  ;;  %v1269_v2 = vsub.f32 %v2903_v30, %v1196_v19 }
 0x348   : > { %v1286_v1 = vmul.f32 1.442695, %v1269_v2 }
 0x34a   : > { %2347 = vpow2.f32 %v1286_v1  ;;  %v1221_v38 = vpop.permute.xlu1 %1220 }
 0x34b   : > { %v1274_v29 = vsub.f32 %v2907_v31, %v1221_v38 }
 0x34c   : > { %v2342_v47 = vpop.eup %2341 }
 0x34d   : > { %v2344_v54 = vpop.eup %2343  ;;  %v1296_v16 = vmul.f32 1.442695, %v1274_v29  ;;  %1352 = vadd.xlane.f32.xlu0 %v2342_v47 }
 0x34e   : > { %1348 = vadd.xlane.f32.xlu1 %v2344_v54  ;;  %v1211_v53 = vpop.permute.xlu1 %1210 }
 0x34f   : > { %2349 = vpow2.f32 %v1296_v16  ;;  %v1272_v18 = vsub.f32 %v2909_v42, %v1211_v53 }
 0x350   : > { %v2346_v28 = vpop.eup %2345 }
 0x351   : > { %v1292_v9 = vmul.f32 1.442695, %v1272_v18  ;;  %v1526_v62 = vpack.c.bf16 %v2346_v28, %v2342_v47 }
 0x352   : > { %1354 = vadd.xlane.f32.xlu1 %v2346_v28  ;;  %v1216_v11 = vpop.permute.xlu1 %1215 }
 0x353   : > { %2351 = vpow2.f32 %v1292_v9  ;;  %v1273_v30 = vsub.f32 %v2915_v52, %v1216_v11  ;;  %v1236_v60 = vpop.permute.xlu0 %1235 }
 0x354   : > { %v2348_v63 = vpop.eup %2347  ;;  %v1277_v27 = vsub.f32 %v2927_v48, %v1236_v60 }
 0x355   : > { %v1294_v31 = vmul.f32 1.442695, %v1273_v30  ;;  %1350 = vadd.xlane.f32.xlu0 %v2348_v63  ;;  %v1525_v57 = vpack.c.bf16 %v2348_v63, %v2344_v54 }
 0x356   : > { %v1226_v26 = vpop.permute.xlu1 %1225  ;;  %v1302_v38 = vmul.f32 1.442695, %v1277_v27 }
 0x357   : > { %2353 = vpow2.f32 %v1294_v31  ;;  %v1275_v19 = vsub.f32 %v2912_v43, %v1226_v26  ;;  %v1246_v42 = vpop.permute.xlu0 %1245  ;;  %2221 = vmatprep.mubr.bf16.mxu0 %v1525_v57 }
 0x358   : > { %2222 = vmatmul.mubr.bf16.vlgmr.msra.gmra.mrb[32].mxu0 %v1526_v62  ;;  %v1279_v29 = vsub.f32 %v2924_v41, %v1246_v42 }
 0x359   : > { %v2350_v2 = vpop.eup %2349  ;;  %v1298_v1 = vmul.f32 1.442695, %v1275_v19 }
 0x35a   : > { %1360 = vadd.xlane.f32.xlu0 %v2350_v2  ;;  %v1231_v52 = vpop.permute.xlu1 %1230  ;;  %v1306_v53 = vmul.f32 1.442695, %v1279_v29 }
 0x35b   : > { %2355 = vpow2.f32 %v1298_v1  ;;  %v1276_v47 = vsub.f32 %v2921_v40, %v1231_v52  ;;  %v1256_v54 = vpop.permute.xlu0 %1255 }
 0x35c   : > { %2357 = vpow2.f32 %v1302_v38  ;;  %v1281_v43 = vsub.f32 %v2939_v51, %v1256_v54 }
 0x35d   : > { %v2352_v16 = vpop.eup %2351  ;;  %v1300_v48 = vmul.f32 1.442695, %v1276_v47 }
 0x35e   : > { %1356 = vadd.xlane.f32.xlu0 %v2352_v16  ;;  %v1241_v18 = vpop.permute.xlu1 %1240  ;;  %v1310_v11 = vmul.f32 1.442695, %v1281_v43 }
 0x35f   : > { %2359 = vpow2.f32 %v1300_v48  ;;  %v1278_v28 = vsub.f32 %v2919_v36, %v1241_v18  ;;  %v1266_v9 = vpop.permute.xlu0 %1265  ;;  %v1184_v48 = vmul.f32 1.442695, %v1154_v24 }
 0x360   : > { %2361 = vpow2.f32 %v1306_v53  ;;  %v1283_v30 = vsub.f32 %v2936_v50, %v1266_v9  ;;  %v1186_v53 = vmul.f32 1.442695, %v1155_v17 }
 0x361   : > { %v2354_v62 = vpop.eup %2353  ;;  %v1304_v41 = vmul.f32 1.442695, %v1278_v28 }
 0x362   : > { %v1251_v40 = vpop.permute.xlu1 %1250  ;;  %v1527_v60 = vpack.c.bf16 %v2354_v62, %v2352_v16  ;;  %v1314_v57 = vmul.f32 1.442695, %v1283_v30 }
 0x363   : > { %2363 = vpow2.f32 %v1304_v41  ;;  %v1280_v63 = vsub.f32 %v2933_v49, %v1251_v40  ;;  %v3185_v28 = vpop.permute.xlu0 %1431 }
 0x364   : > { %2225 = vmatprep.mubr.bf16.mxu0 %v1527_v60  ;;  %2365 = vpow2.f32 %v1310_v11  ;;  %v1318_v60 = vld [vmem:[#allocation4 + $0x10] sm:$0xff] }
 0x365   : > { %v2356_v31 = vpop.eup %2355  ;;  %v1308_v51 = vmul.f32 1.442695, %v1280_v63 }
 0x366   : > { %1362 = vadd.xlane.f32.xlu1 %v2356_v31  ;;  %v1261_v27 = vpop.permute.xlu1 %1260  ;;  %v1528_v36 = vpack.c.bf16 %v2356_v31, %v2350_v2  ;;  %v2358_v19 = vpop.eup %2357  ;;  %v1316_v31 = vld [vmem:[#allocation4] sm:$0xff] }
 0x367   : > { %2367 = vpow2.f32 %v1308_v51  ;;  %v1282_v26 = vsub.f32 %v2931_v39, %v1261_v27  ;;  %v3189_v4 = vpop.permute.xlu0 %1446  ;;  %v1334_v51 = vmul.f32 %v3125_v61, %v1318_v60  ;;  %v1332_v27 = vmul.f32 %v3103_v8, %v1316_v31  ;;  %v1322_v8 = vld [vmem:[#allocation4 + $0x30] sm:$0xff]  ;;  %v1321_v31 = vld [vmem:[#allocation4 + $0x28] sm:$0xff] }
 0x368   : > { %2226 = vmatmul.mubr.bf16.gmra.mrb[36].mxu0 %v1528_v36  ;;  %2369 = vpow2.f32 %v1314_v57 }
 0x369   : > { %v2360_v42 = vpop.eup %2359  ;;  %v1312_v50 = vmul.f32 1.442695, %v1282_v26 }
 0x36a   : > { %1358 = vadd.xlane.f32.xlu1 %v2354_v62  ;;  %v1529_v1 = vpack.c.bf16 %v2358_v19, %v2360_v42  ;;  %v2362_v49 = vpop.eup %2361  ;;  %v3187_v9 = vpop.permute.xlu1 %1436 }
 0x36b   : > { %2371 = vpow2.f32 %v1312_v50  ;;  %v3193_v24 = vpop.permute.xlu0 %1456 }
 0x36c   : > { %2229 = vmatprep.mubr.bf16.mxu0 %v1529_v1  ;;  %2373 = vpow2.f32 %v1184_v48  ;;  %v1317_v1 = vld [vmem:[#allocation4 + $0x8] sm:$0xff] }
 0x36d   : > { %v2364_v38 = vpop.eup %2363  ;;  %2375 = vpow2.f32 %v1186_v53 }
 0x36e   : > { %1370 = vadd.xlane.f32.xlu1 %v2362_v49  ;;  %1368 = vadd.xlane.f32.xlu0 %v2364_v38  ;;  %v1530_v29 = vpack.c.bf16 %v2362_v49, %v2364_v38  ;;  %v2366_v52 = vpop.eup %2365  ;;  %v3191_v12 = vpop.permute.xlu1 %1441 }
 0x36f   : > { %v3197_v55 = vpop.permute.xlu0 %1466 }
 0x370   : > { %2230 = vmatmul.mubr.bf16.gmra.mrb[40].mxu0 %v1530_v29  ;;  %v1333_v29 = vmul.f32 %v3117_v25, %v1317_v1  ;;  %v1323_v25 = vld [vmem:[#allocation4 + $0x38] sm:$0xff]  ;;  %v1325_v1 = vld [vmem:[#allocation4 + $0x48] sm:$0xff] }
 0x371   : > { %v2368_v2 = vpop.eup %2367  ;;  %v1339_v53 = vmul.f32 %v3127_v58, %v1323_v25  ;;  %v1324_v58 = vld [vmem:[#allocation4 + $0x40] sm:$0xff] }
 0x372   : > { %1366 = vadd.xlane.f32.xlu1 %v2358_v19  ;;  %1364 = vadd.xlane.f32.xlu0 %v2360_v42  ;;  %v1531_v39 = vpack.c.bf16 %v2366_v52, %v2368_v2  ;;  %v2370_v47 = vpop.eup %2369  ;;  %v3195_v37 = vpop.permute.xlu1 %1451  ;;  %v1319_v19 = vld [vmem:[#allocation4 + $0x18] sm:$0xff] }
 0x373   : > { %v3201_v62 = vpop.permute.xlu0 %1486  ;;  %v1335_v50 = vmul.f32 %v3111_v0, %v1319_v19 }
 0x374   : > { %2233 = vmatprep.mubr.bf16.mxu0 %v1531_v39 }
 0x375   : > { %v2372_v54 = vpop.eup %2371 }
 0x376   : > { %1378 = vadd.xlane.f32.xlu1 %v2370_v47  ;;  %1376 = vadd.xlane.f32.xlu0 %v2372_v54  ;;  %v1532_v16 = vpack.c.bf16 %v2370_v47, %v2372_v54  ;;  %v3179_v43 = vpop.eup %2373  ;;  %v3199_v17 = vpop.permute.xlu1 %1461  ;;  %v1320_v47 = vld [vmem:[#allocation4 + $0x20] sm:$0xff] }
 0x377   : > { %v3182_v18 = vpop.eup %2375  ;;  %v3205_v11 = vpop.permute.xlu0 %1476  ;;  %v1336_v0 = vmul.f32 %v3133_v59, %v1320_v47 }
 0x378   : > { %2234 = vmatmul.mubr.bf16.gmra.mrb[44].mxu0 %v1532_v16 }
 0x37a   : > { %1374 = vadd.xlane.f32.xlu1 %v2366_v52  ;;  %1372 = vadd.xlane.f32.xlu0 %v2368_v2  ;;  %v3203_v41 = vpop.permute.xlu1 %1481  ;;  %v1338_v2 = vmul.f32 %v3139_v10, %v1322_v8  ;;  %v1337_v10 = vmul.f32 %v3119_v6, %v1321_v31  ;;  %v1340_v6 = vmul.f32 %v3151_v56, %v1324_v58  ;;  %v1330_v8 = vld [vmem:[#allocation4 + $0x70] sm:$0xff]  ;;  %v1329_v56 = vld [vmem:[#allocation4 + $0x68] sm:$0xff] }
 0x37b   : > { %v3209_v40 = vpop.permute.xlu0 %1496 }
 0x37e   : > { %v3207_v30 = vpop.permute.xlu1 %1471 }
 0x382   : > { %v3211_v63 = vpop.permute.xlu1 %1491 }
 0x38b   : > { %1501 = vperm.xlu1 %2312, %v3179_v43  }
 0x390   : > { %1506 = vperm.xlu0 %2311, %v3182_v18  }
 0x3da   : > { %v1353_v57 = vpop.xlane.xlu0 %1352 }
 0x3db   : > { %v1382_v36 = vadd.f32 %v1353_v57, %v1334_v51  ;;  %v1349_v26 = vpop.xlane.xlu1 %1348 }
 0x3dc   : > { %v1380_v42 = vadd.f32 %v1349_v26, %v1332_v27  ;;  %v1326_v27 = vld [vmem:[#allocation4 + $0x50] sm:$0xff] }
 0x3dd   : > { %1399 = vst.msk [vmem:[#allocation4 + $0x10] sm:$0xff] %vm1396_vm4, %v1382_v36  ;;  %v1327_v36 = vld [vmem:[#allocation4 + $0x58] sm:$0xff]  ;;  %v1342_v59 = vmul.f32 %v3145_v7, %v1326_v27  ;;  %v1414_v27 = vld [vmem:[#allocation2 + $0x8] sm:$0xff] }
 0x3de   : > { %1397 = vst.msk [vmem:[#allocation4] sm:$0xff] %vm1396_vm4, %v1380_v42  ;;  %v1343_v19 = vmul.f32 %v3135_v3, %v1327_v36  ;;  %v1331_v7 = vld [vmem:[#allocation4 + $0x78] sm:$0xff] }
 0x3df   : > { %v1355_v49 = vpop.xlane.xlu1 %1354  ;;  %v1347_v47 = vmul.f32 %v3182_v18, %v1331_v7  ;;  %v1415_v18 = vld [vmem:[#allocation2 + $0x10] sm:$0xff] }
 0x3e0   : > { %v1383_v38 = vadd.f32 %v1355_v49, %v1335_v50  ;;  %v1511_v36 = vmul.f32 %v3191_v12, %v1415_v18  ;;  %v1417_v12 = vld [vmem:[#allocation2 + $0x20] sm:$0xff] }
 0x3e2   : > { %1400 = vst.msk [vmem:[#allocation4 + $0x18] sm:$0xff] %vm1396_vm4, %v1383_v38  ;;  %v1351_v61 = vpop.xlane.xlu0 %1350 }
 0x3e3   : > { %v1381_v52 = vadd.f32 %v1351_v61, %v1333_v29  ;;  %v1341_v29 = vmul.f32 %v3141_v46, %v1325_v1 }
 0x3e5   : > { %1398 = vst.msk [vmem:[#allocation4 + $0x8] sm:$0xff] %vm1396_vm4, %v1381_v52 }
 0x3e7   : > { %v1361_v39 = vpop.xlane.xlu0 %1360 }
 0x3e8   : > { %v1386_v54 = vadd.f32 %v1361_v39, %v1338_v2  ;;  %v1346_v39 = vmul.f32 %v3179_v43, %v1330_v8 }
 0x3ea   : > { %1403 = vst.msk [vmem:[#allocation4 + $0x30] sm:$0xff] %vm1396_vm4, %v1386_v54 }
 0x3eb   : > { %v1357_v16 = vpop.xlane.xlu0 %1356 }
 0x3ec   : > { %v1384_v48 = vadd.f32 %v1357_v16, %v1336_v0  ;;  %v1328_v16 = vld [vmem:[#allocation4 + $0x60] sm:$0xff] }
 0x3ed   : > { %v1344_v25 = vmul.f32 %v3154_v13, %v1328_v16 }
 0x3ee   : > { %1401 = vst.msk [vmem:[#allocation4 + $0x20] sm:$0xff] %vm1396_vm4, %v1384_v48 }
 0x3f3   : > { %v1363_v60 = vpop.xlane.xlu1 %1362 }
 0x3f4   : > { %v1387_v51 = vadd.f32 %v1363_v60, %v1339_v53  ;;  %v1345_v53 = vmul.f32 %v3147_v5, %v1329_v56 }
 0x3f6   : > { %1404 = vst.msk [vmem:[#allocation4 + $0x38] sm:$0xff] %vm1396_vm4, %v1387_v51 }
 0x3f7   : > { %v1359_v57 = vpop.xlane.xlu1 %1358 }
 0x3f8   : > { %v1385_v26 = vadd.f32 %v1359_v57, %v1337_v10  ;;  %v1413_v10 = vld [vmem:[#allocation2] sm:$0xff]  ;;  %v1416_v57 = vld [vmem:[#allocation2 + $0x18] sm:$0xff] }
 0x3f9   : > { %v1512_v13 = vmul.f32 %v3189_v4, %v1416_v57  ;;  %v1420_v4 = vld [vmem:[#allocation2 + $0x38] sm:$0xff] }
 0x3fa   : > { %1402 = vst.msk [vmem:[#allocation4 + $0x28] sm:$0xff] %vm1396_vm4, %v1385_v26  ;;  %v1509_v26 = vmul.f32 %v3185_v28, %v1413_v10  ;;  %v1419_v28 = vld [vmem:[#allocation2 + $0x30] sm:$0xff] }
 0x3fb   : > { %v1369_v42 = vpop.xlane.xlu0 %1368  ;;  %v1371_v50 = vpop.xlane.xlu1 %1370  ;;  %v1427_v10 = vld [vmem:[#allocation2 + $0x70] sm:$0xff] }
 0x3fc   : > { %v1390_v49 = vadd.f32 %v1369_v42, %v1342_v59  ;;  %v1391_v38 = vadd.f32 %v1371_v50, %v1343_v19  ;;  %v1510_v42 = vmul.f32 %v3187_v9, %v1414_v27  ;;  %v1513_v9 = vmul.f32 %v3195_v37, %v1417_v12  ;;  %v1424_v37 = vld [vmem:[#allocation2 + $0x58] sm:$0xff]  ;;  %v1425_v27 = vld [vmem:[#allocation2 + $0x60] sm:$0xff] }
 0x3fd   : > { %v1693_v12 = vld [vmem:[#allocation4 + $0x18] sm:$0xff] (!%p2048_p10) }
 0x3fe   : > { %1407 = vst.msk [vmem:[#allocation4 + $0x50] sm:$0xff] %vm1396_vm4, %v1390_v49  ;;  %1408 = vst.msk [vmem:[#allocation4 + $0x58] sm:$0xff] %vm1396_vm4, %v1391_v38 }
 0x3ff   : > { %v1365_v61 = vpop.xlane.xlu0 %1364  ;;  %v1367_v52 = vpop.xlane.xlu1 %1366 }
 0x400   : > { %v1388_v2 = vadd.f32 %v1365_v61, %v1340_v6  ;;  %v1389_v3 = vadd.f32 %v1367_v52, %v1341_v29  ;;  %v1418_v6 = vld [vmem:[#allocation2 + $0x28] sm:$0xff]  ;;  %v1515_v29 = vmul.f32 %v3199_v17, %v1419_v28  ;;  %v1516_v52 = vmul.f32 %v3197_v55, %v1420_v4  ;;  %v1421_v17 = vld [vmem:[#allocation2 + $0x40] sm:$0xff] }
 0x401   : > { %v1422_v55 = vld [vmem:[#allocation2 + $0x48] sm:$0xff]  ;;  %v1690_v28 = vld [vmem:[#allocation4] sm:$0xff] (!%p2048_p10) }
 0x402   : > { %1405 = vst.msk [vmem:[#allocation4 + $0x40] sm:$0xff] %vm1396_vm4, %v1388_v2  ;;  %1406 = vst.msk [vmem:[#allocation4 + $0x48] sm:$0xff] %vm1396_vm4, %v1389_v3  ;;  %v1514_v2 = vmul.f32 %v3193_v24, %v1418_v6  ;;  %v1517_v24 = vmul.f32 %v3207_v30, %v1421_v17  ;;  %v1428_v30 = vld [vmem:[#allocation2 + $0x78] sm:$0xff]  ;;  %v1691_v4 = vld [vmem:[#allocation4 + $0x8] sm:$0xff] (!%p2048_p10) }
 0x403   : > { %v1377_v54 = vpop.xlane.xlu0 %1376  ;;  %v1379_v0 = vpop.xlane.xlu1 %1378  ;;  %v1695_v6 = vld [vmem:[#allocation4 + $0x28] sm:$0xff] (!%p2048_p10) }
 0x404   : > { %v1394_v48 = vadd.f32 %v1377_v54, %v1346_v39  ;;  %v1395_v46 = vadd.f32 %v1379_v0, %v1347_v47  ;;  %v1423_v0 = vld [vmem:[#allocation2 + $0x50] sm:$0xff] }
 0x405   : > { %v1519_v56 = vmul.f32 %v3203_v41, %v1423_v0  ;;  %v1700_v0 = vld [vmem:[#allocation4 + $0x50] sm:$0xff] (!%p2048_p10) }
 0x406   : > { %1411 = vst.msk [vmem:[#allocation4 + $0x70] sm:$0xff] %vm1396_vm4, %v1394_v48  ;;  %1412 = vst.msk [vmem:[#allocation4 + $0x78] sm:$0xff] %vm1396_vm4, %v1395_v46  ;;  %v1520_v46 = vmul.f32 %v3201_v62, %v1424_v37 }
 0x407   : > { %v1373_v60 = vpop.xlane.xlu0 %1372  ;;  %v1375_v31 = vpop.xlane.xlu1 %1374 }
 0x408   : > { %v1392_v51 = vadd.f32 %v1373_v60, %v1344_v25  ;;  %v1393_v43 = vadd.f32 %v1375_v31, %v1345_v53  ;;  %v1518_v60 = vmul.f32 %v3205_v11, %v1422_v55 }
 0x40a   : > { %1409 = vst.msk [vmem:[#allocation4 + $0x60] sm:$0xff] %vm1396_vm4, %v1392_v51  ;;  %1410 = vst.msk [vmem:[#allocation4 + $0x68] sm:$0xff] %vm1396_vm4, %v1393_v43 }
 0x40b   : > { %v1502_v57 = vpop.permute.xlu1 %1501 }
 0x40c   : > { %v1523_v11 = vmul.f32 %v1502_v57, %v1427_v10 }
 0x40f   : > { %v1507_v62 = vpop.permute.xlu0 %1506 }
 0x411   : > { %v1703_v17 = vld [vmem:[#allocation4 + $0x68] sm:$0xff] (!%p2048_p10)  ;;  %v1702_v55 = vld [vmem:[#allocation4 + $0x60] sm:$0xff] (!%p2048_p10) }
 0x42b   : > { %v2223_v59 = vpop.f32.mrb[32].mxu0 }
 0x42c   : > { %v1640_v5 = vadd.f32 %v2223_v59, %v1511_v36  ;;  %v1575_v19 = vpop.f32.mrb[33].mxu0  ;;  %v1426_v36 = vld [vmem:[#allocation2 + $0x68] sm:$0xff] }
 0x42d   : > { %v1638_v50 = vadd.f32 %v1575_v19, %v1509_v26  ;;  %v2224_v58 = vpop.f32.mrb[34].mxu0  ;;  %v1521_v26 = vmul.f32 %v3211_v63, %v1425_v27  ;;  %v1692_v63 = vld [vmem:[#allocation4 + $0x10] sm:$0xff] (!%p2048_p10) }
 0x42e   : > { %1656 = vst.msk [vmem:[#allocation2 + $0x10] sm:$0xff] %vm542_vm2, %v1640_v5  ;;  %v1641_v1 = vadd.f32 %v2224_v58, %v1512_v13  ;;  %v1578_v49 = vpop.f32.mrb[35].mxu0  ;;  %v1524_v13 = vmul.f32 %v1507_v62, %v1428_v30  ;;  %2379 = vrcp.f32 (!%p2048_p10), %v1692_v63 }
 0x42f   : > { %1654 = vst.msk [vmem:[#allocation2] sm:$0xff] %vm542_vm2, %v1638_v50  ;;  %v1639_v38 = vadd.f32 %v1578_v49, %v1510_v42  ;;  %v1522_v42 = vmul.f32 %v3209_v40, %v1426_v36  ;;  %v2470_v40 = vmov (!%p2048_p10), 0   ;;  %2381 = vrcp.f32 (!%p2048_p10), %v1690_v28 }
 0x430   : > { %1657 = vst.msk [vmem:[#allocation2 + $0x18] sm:$0xff] %vm542_vm2, %v1641_v1  ;;  %2378 = vset.pattern.permute.xlu1 (!%p2048_p10), %v2470_v40  ;;  %2377 = vset.pattern.permute.xlu0 (!%p2048_p10), %v2470_v40  ;;  %2383 = vrcp.f32 (!%p2048_p10), %v1693_v12 }
 0x431   : > { %1655 = vst.msk [vmem:[#allocation2 + $0x8] sm:$0xff] %vm542_vm2, %v1639_v38  ;;  %2385 = vrcp.f32 (!%p2048_p10), %v1691_v4 }
 0x432   : > { %2387 = vrcp.f32 (!%p2048_p10), %v1695_v6 }
 0x435   : > { %v1724_v10 = vld [vmem:[#allocation2 + $0x10] sm:$0xff] (!%p2048_p10) }
 0x436   : > { %v1722_v57 = vld [vmem:[#allocation2] sm:$0xff] (!%p2048_p10) }
 0x43b   : > { %v2227_v61 = vpop.f32.mrb[36].mxu0 }
 0x43c   : > { %v1644_v8 = vadd.f32 %v2227_v61, %v1515_v29  ;;  %v1591_v7 = vpop.f32.mrb[37].mxu0  ;;  %v1694_v29 = vld [vmem:[#allocation4 + $0x20] sm:$0xff] (!%p2048_p10)  ;;  %v1696_v61 = vld [vmem:[#allocation4 + $0x30] sm:$0xff] (!%p2048_p10) }
 0x43d   : > { %v1642_v3 = vadd.f32 %v1591_v7, %v1513_v9  ;;  %v2228_v39 = vpop.f32.mrb[38].mxu0  ;;  %2389 = vrcp.f32 (!%p2048_p10), %v1694_v29  ;;  %v1697_v9 = vld [vmem:[#allocation4 + $0x38] sm:$0xff] (!%p2048_p10)  ;;  %v1699_v7 = vld [vmem:[#allocation4 + $0x48] sm:$0xff] (!%p2048_p10) }
 0x43e   : > { %1660 = vst.msk [vmem:[#allocation2 + $0x30] sm:$0xff] %vm542_vm2, %v1644_v8  ;;  %v1645_v47 = vadd.f32 %v2228_v39, %v1516_v52  ;;  %v1594_v54 = vpop.f32.mrb[39].mxu0  ;;  %v2380_v52 = vpop.eup (!%p2048_p10), %2379  ;;  %2391 = vrcp.f32 (!%p2048_p10), %v1697_v9 }
 0x43f   : > { %1658 = vst.msk [vmem:[#allocation2 + $0x20] sm:$0xff] %vm542_vm2, %v1642_v3  ;;  %v1643_v16 = vadd.f32 %v1594_v54, %v1514_v2  ;;  %v2382_v8 = vpop.eup (!%p2048_p10), %2381  ;;  %1750 = vperm.xlu1 (!%p2048_p10), %2378, %v2380_v52   ;;  %2393 = vrcp.f32 (!%p2048_p10), %v1696_v61  ;;  %v1698_v3 = vld [vmem:[#allocation4 + $0x40] sm:$0xff] (!%p2048_p10) }
 0x440   : > { %1661 = vst.msk [vmem:[#allocation2 + $0x38] sm:$0xff] %vm542_vm2, %v1645_v47  ;;  %v2384_v2 = vpop.eup (!%p2048_p10), %2383  ;;  %1740 = vperm.xlu0 (!%p2048_p10), %2377, %v2382_v8   ;;  %2395 = vrcp.f32 (!%p2048_p10), %v1699_v7  ;;  %v1701_v47 = vld [vmem:[#allocation4 + $0x58] sm:$0xff] (!%p2048_p10) }
 0x441   : > { %1659 = vst.msk [vmem:[#allocation2 + $0x28] sm:$0xff] %vm542_vm2, %v1643_v16  ;;  %v2386_v39 = vpop.eup (!%p2048_p10), %2385  ;;  %2397 = vrcp.f32 (!%p2048_p10), %v1698_v3 }
 0x442   : > { %v2388_v54 = vpop.eup (!%p2048_p10), %2387  ;;  %2399 = vrcp.f32 (!%p2048_p10), %v1701_v47 }
 0x443   : > { %v2231_v48 = vpop.f32.mrb[40].mxu0  ;;  %1755 = vperm.xlu1 (!%p2048_p10), %2378, %v2384_v2   ;;  %2401 = vrcp.f32 (!%p2048_p10), %v1700_v0 }
 0x444   : > { %v1648_v25 = vadd.f32 %v2231_v48, %v1519_v56  ;;  %v1607_v53 = vpop.f32.mrb[41].mxu0  ;;  %1745 = vperm.xlu0 (!%p2048_p10), %2377, %v2386_v39   ;;  %2403 = vrcp.f32 (!%p2048_p10), %v1703_v17 }
 0x445   : > { %v1646_v31 = vadd.f32 %v1607_v53, %v1517_v24  ;;  %v2232_v51 = vpop.f32.mrb[42].mxu0  ;;  %2405 = vrcp.f32 (!%p2048_p10), %v1702_v55  ;;  %v1705_v24 = vld [vmem:[#allocation4 + $0x78] sm:$0xff] (!%p2048_p10)  ;;  %v1728_v61 = vld [vmem:[#allocation2 + $0x30] sm:$0xff] (!%p2048_p10) }
 0x446   : > { %1664 = vst.msk [vmem:[#allocation2 + $0x50] sm:$0xff] %vm542_vm2, %v1648_v25  ;;  %v1649_v43 = vadd.f32 %v2232_v51, %v1520_v46  ;;  %v1610_v18 = vpop.f32.mrb[43].mxu0  ;;  %v1704_v46 = vld [vmem:[#allocation4 + $0x70] sm:$0xff] (!%p2048_p10)  ;;  %2407 = vrcp.f32 (!%p2048_p10), %v1705_v24  ;;  %v1726_v63 = vld [vmem:[#allocation2 + $0x20] sm:$0xff] (!%p2048_p10) }
 0x447   : > { %1662 = vst.msk [vmem:[#allocation2 + $0x40] sm:$0xff] %vm542_vm2, %v1646_v31  ;;  %v1647_v41 = vadd.f32 %v1610_v18, %v1518_v60  ;;  %v2390_v16 = vpop.eup (!%p2048_p10), %2389  ;;  %1765 = vperm.xlu1 (!%p2048_p10), %2378, %v2388_v54   ;;  %2409 = vrcp.f32 (!%p2048_p10), %v1704_v46  ;;  %v1729_v29 = vld [vmem:[#allocation2 + $0x38] sm:$0xff] (!%p2048_p10) }
 0x448   : > { %1665 = vst.msk [vmem:[#allocation2 + $0x58] sm:$0xff] %vm542_vm2, %v1649_v43  ;;  %v2392_v37 = vpop.eup (!%p2048_p10), %2391  ;;  %1760 = vperm.xlu0 (!%p2048_p10), %2377, %v2390_v16  }
 0x449   : > { %1663 = vst.msk [vmem:[#allocation2 + $0x48] sm:$0xff] %vm542_vm2, %v1647_v41  ;;  %v2394_v56 = vpop.eup (!%p2048_p10), %2393  ;;  %v3276_v41 = vstv (!%p2048_p10), %s1834_s11 }
 0x44a   : > { %v2396_v48 = vpop.eup (!%p2048_p10), %2395 }
 0x44b   : > { %v2235_v59 = vpop.f32.mrb[44].mxu0  ;;  %1689 = sbr.rel (%p2048_p10) target bundleno = 1251 (0x4e3), region = 64  ;;  %1775 = vperm.xlu1 (!%p2048_p10), %2378, %v2392_v37   ;;  %v2398_v25 = vpop.eup (!%p2048_p10), %2397 }
 0x44c   : > { %v1652_v5 = vadd.f32 %v2235_v59, %v1523_v11  ;;  %v1623_v19 = vpop.f32.mrb[45].mxu0  ;;  %1770 = vperm.xlu0 (!%p2048_p10), %2377, %v2394_v56   ;;  %v2400_v53 = vpop.eup (!%p2048_p10), %2399  ;;  %v1725_v11 = vld [vmem:[#allocation2 + $0x18] sm:$0xff] (!%p2048_p10)  ;;  %v1723_v59 = vld [vmem:[#allocation2 + $0x8] sm:$0xff] (!%p2048_p10) }
 0x44d   : > { %v1650_v50 = vadd.f32 %v1623_v19, %v1521_v26  ;;  %v2236_v58 = vpop.f32.mrb[46].mxu0  ;;  %v2402_v60 = vpop.eup (!%p2048_p10), %2401 }
 0x44e   : > { %1668 = vst.msk [vmem:[#allocation2 + $0x70] sm:$0xff] %vm542_vm2, %v1652_v5  ;;  %v1653_v1 = vadd.f32 %v2236_v58, %v1524_v13  ;;  %v1626_v49 = vpop.f32.mrb[47].mxu0  ;;  %v2404_v31 = vpop.eup (!%p2048_p10), %2403  ;;  %v1730_v54 = vld [vmem:[#allocation2 + $0x40] sm:$0xff] (!%p2048_p10) }
 0x44f   : > { %1666 = vst.msk [vmem:[#allocation2 + $0x60] sm:$0xff] %vm542_vm2, %v1650_v50  ;;  %v1651_v38 = vadd.f32 %v1626_v49, %v1522_v42  ;;  %1785 = vperm.xlu1 (!%p2048_p10), %2378, %v2396_v48   ;;  %v2406_v51 = vpop.eup (!%p2048_p10), %2405  ;;  %v1727_v49 = vld [vmem:[#allocation2 + $0x28] sm:$0xff] (!%p2048_p10)  ;;  %v1733_v56 = vld [vmem:[#allocation2 + $0x58] sm:$0xff] (!%p2048_p10)  ;;  %v1732_v48 = vld [vmem:[#allocation2 + $0x50] sm:$0xff] (!%p2048_p10) }
 0x450   : > { %1669 = vst.msk [vmem:[#allocation2 + $0x78] sm:$0xff] %vm542_vm2, %v1653_v1  ;;  %1780 = vperm.xlu0 (!%p2048_p10), %2377, %v2398_v25   ;;  %v2408_v43 = vpop.eup (!%p2048_p10), %2407  ;;  %v1731_v39 = vld [vmem:[#allocation2 + $0x48] sm:$0xff] (!%p2048_p10) }
 0x451   : > { %1667 = vst.msk [vmem:[#allocation2 + $0x68] sm:$0xff] %vm542_vm2, %v1651_v38  ;;  %v2410_v18 = vpop.eup (!%p2048_p10), %2409 }
 0x453   : > { %1795 = vperm.xlu1 %2378, %v2400_v53  }
 0x454   : > { %1790 = vperm.xlu0 %2377, %v2402_v60  }
 0x457   : > { %1805 = vperm.xlu1 %2378, %v2404_v31  }
 0x458   : > { %1800 = vperm.xlu0 %2377, %v2406_v51   ;;  %v1735_v51 = vld [vmem:[#allocation2 + $0x68] sm:$0xff] }
 0x45b   : > { %1815 = vperm.xlu1 %2378, %v2408_v43  }
 0x45c   : > { %1810 = vperm.xlu0 %2377, %v2410_v18   ;;  %v1734_v18 = vld [vmem:[#allocation2 + $0x60] sm:$0xff] }
 0x4be   : > { %v1751_v27 = vpop.permute.xlu1 %1750 }
 0x4bf   : > { %v1820_v30 = vmul.f32 %v1751_v27, %v1724_v10  ;;  %v1741_v62 = vpop.permute.xlu0 %1740 }
 0x4c0   : > { %v1818_v36 = vmul.f32 %v1741_v62, %v1722_v57 }
 0x4c1   : > { %v1838_v26 = vmul.f32 %v3276_v41, %v1820_v30 }
 0x4c2   : > { %v1836_v13 = vmul.f32 %v3276_v41, %v1818_v36  ;;  %v1756_v5 = vpop.permute.xlu1 %1755  ;;  %v1737_v36 = vld [vmem:[#allocation2 + $0x78] sm:$0xff] }
 0x4c3   : > { %v1854_v19 = vadd.f32 %v1838_v26, %v2667_v20  ;;  %v1821_v42 = vmul.f32 %v1756_v5, %v1725_v11  ;;  %v1746_v50 = vpop.permute.xlu0 %1745  ;;  %v1736_v26 = vld [vmem:[#allocation2 + $0x70] sm:$0xff] }
 0x4c4   : > { %v1852_v58 = vadd.f32 %v1836_v13, %v2652_v14  ;;  %v1819_v1 = vmul.f32 %v1746_v50, %v1723_v59  ;;  %v3383_v13 = vld [vmem:[#allocation9_spill] sm:$0xff] }
 0x4c5   : > { %1870 = vst.msk [vmem:[%s2577_s30 + $0x10] sm:$0xff] %vm542_vm2, %v1854_v19  ;;  %v1839_v38 = vmul.f32 %v3276_v41, %v1821_v42 }
 0x4c6   : > { %1868 = vst.msk [vmem:[%s2577_s30] sm:$0xff] %vm542_vm2, %v1852_v58  ;;  %v1837_v28 = vmul.f32 %v3276_v41, %v1819_v1  ;;  %v1766_v12 = vpop.permute.xlu1 %1765 }
 0x4c7   : > { %v1855_v20 = vadd.f32 %v1839_v38, %v2670_v21  ;;  %v1823_v40 = vmul.f32 %v1766_v12, %v1727_v49  ;;  %v1761_v4 = vpop.permute.xlu0 %1760  ;;  %v3385_v38 = vld [vmem:[#allocation11_spill] sm:$0xff] }
 0x4c8   : > { %v1853_v14 = vadd.f32 %v1837_v28, %v2655_v15  ;;  %v1822_v6 = vmul.f32 %v1761_v4, %v1726_v63  ;;  %v3386_v28 = vld [vmem:[#allocation10_spill] sm:$0xff] }
 0x4c9   : > { %1871 = vst.msk [vmem:[%s2577_s30 + $0x18] sm:$0xff] %vm542_vm2, %v1855_v20  ;;  %v1841_v9 = vmul.f32 %v3276_v41, %v1823_v40 }
 0x4ca   : > { %1869 = vst.msk [vmem:[%s2577_s30 + $0x8] sm:$0xff] %vm542_vm2, %v1853_v14  ;;  %v1840_v52 = vmul.f32 %v3276_v41, %v1822_v6  ;;  %v1776_v8 = vpop.permute.xlu1 %1775 }
 0x4cb   : > { %v1857_v21 = vadd.f32 %v1841_v9, %v2676_v23  ;;  %v1825_v7 = vmul.f32 %v1776_v8, %v1729_v29  ;;  %v1771_v2 = vpop.permute.xlu0 %1770 }
 0x4cc   : > { %v1856_v15 = vadd.f32 %v1840_v52, %v2673_v22  ;;  %v1824_v3 = vmul.f32 %v1771_v2, %v1728_v61 }
 0x4cd   : > { %1873 = vst.msk [vmem:[%s2577_s30 + $0x28] sm:$0xff] %vm542_vm2, %v1857_v21  ;;  %v1843_v47 = vmul.f32 %v3276_v41, %v1825_v7 }
 0x4ce   : > { %1872 = vst.msk [vmem:[%s2577_s30 + $0x20] sm:$0xff] %vm542_vm2, %v1856_v15  ;;  %v1842_v0 = vmul.f32 %v3276_v41, %v1824_v3  ;;  %v1786_v16 = vpop.permute.xlu1 %1785 }
 0x4cf   : > { %v1859_v23 = vadd.f32 %v1843_v47, %v2700_v33  ;;  %v1827_v17 = vmul.f32 %v1786_v16, %v1731_v39  ;;  %v1781_v37 = vpop.permute.xlu0 %1780 }
 0x4d0   : > { %v1858_v22 = vadd.f32 %v1842_v0, %v2697_v32  ;;  %v1826_v55 = vmul.f32 %v1781_v37, %v1730_v54 }
 0x4d1   : > { %1875 = vst.msk [vmem:[%s2577_s30 + $0x38] sm:$0xff] %vm542_vm2, %v1859_v23  ;;  %v1845_v24 = vmul.f32 %v3276_v41, %v1827_v17 }
 0x4d2   : > { %1874 = vst.msk [vmem:[%s2577_s30 + $0x30] sm:$0xff] %vm542_vm2, %v1858_v22  ;;  %v1844_v46 = vmul.f32 %v3276_v41, %v1826_v55  ;;  %v1796_v25 = vpop.permute.xlu1 %1795 }
 0x4d3   : > { %v1861_v33 = vadd.f32 %v1845_v24, %v2706_v35  ;;  %v1829_v53 = vmul.f32 %v1796_v25, %v1733_v56  ;;  %v1791_v60 = vpop.permute.xlu0 %1790 }
 0x4d4   : > { %v1860_v32 = vadd.f32 %v1844_v46, %v2703_v34  ;;  %v1828_v31 = vmul.f32 %v1791_v60, %v1732_v48 }
 0x4d5   : > { %1877 = vst.msk [vmem:[%s2577_s30 + $0x48] sm:$0xff] %vm542_vm2, %v1861_v33  ;;  %v1847_v43 = vmul.f32 %v3276_v41, %v1829_v53 }
 0x4d6   : > { %1876 = vst.msk [vmem:[%s2577_s30 + $0x40] sm:$0xff] %vm542_vm2, %v1860_v32  ;;  %v1846_v10 = vmul.f32 %v3276_v41, %v1828_v31  ;;  %v1806_v57 = vpop.permute.xlu1 %1805 }
 0x4d7   : > { %v1863_v35 = vadd.f32 %v1847_v43, %v2730_v45  ;;  %v1831_v27 = vmul.f32 %v1806_v57, %v1735_v51  ;;  %v1801_v30 = vpop.permute.xlu0 %1800 }
 0x4d8   : > { %v1862_v34 = vadd.f32 %v1846_v10, %v2727_v44  ;;  %v1830_v62 = vmul.f32 %v1801_v30, %v1734_v18  ;;  %v3384_v44 = vld [vmem:[#allocation8_spill] sm:$0xff] }
 0x4d9   : > { %1879 = vst.msk [vmem:[%s2577_s30 + $0x58] sm:$0xff] %vm542_vm2, %v1863_v35  ;;  %v1849_v11 = vmul.f32 %v3276_v41, %v1831_v27 }
 0x4da   : > { %1878 = vst.msk [vmem:[%s2577_s30 + $0x50] sm:$0xff] %vm542_vm2, %v1862_v34  ;;  %v1848_v59 = vmul.f32 %v3276_v41, %v1830_v62  ;;  %v1816_v45 = vpop.permute.xlu1 %1815 }
 0x4db   : > { %v1865_v5 = vadd.f32 %v1849_v11, %v3383_v13  ;;  %v1833_v19 = vmul.f32 %v1816_v45, %v1737_v36  ;;  %v1811_v42 = vpop.permute.xlu0 %1810 }
 0x4dc   : > { %v1864_v50 = vadd.f32 %v1848_v59, %v3384_v44  ;;  %v1832_v58 = vmul.f32 %v1811_v42, %v1736_v26 }
 0x4dd   : > { %1881 = vst.msk [vmem:[%s2577_s30 + $0x68] sm:$0xff] %vm542_vm2, %v1865_v5  ;;  %v1851_v1 = vmul.f32 %v3276_v41, %v1833_v19 }
 0x4de   : > { %1880 = vst.msk [vmem:[%s2577_s30 + $0x60] sm:$0xff] %vm542_vm2, %v1864_v50  ;;  %v1850_v49 = vmul.f32 %v3276_v41, %v1832_v58 }
 0x4df   : > { %v1867_v63 = vadd.f32 %v1851_v1, %v3385_v38 }
 0x4e0   : > { %v1866_v12 = vadd.f32 %v1850_v49, %v3386_v28 }
 0x4e1   : > { %1883 = vst.msk [vmem:[%s2577_s30 + $0x78] sm:$0xff] %vm542_vm2, %v1867_v63 }
 0x4e2   : > { %1882 = vst.msk [vmem:[%s2577_s30 + $0x70] sm:$0xff] %vm542_vm2, %v1866_v12 }
 0x4e3 PF: > { %s20_s17 = sadd.s32 1, %s2465_s17   ;;  %s3387_s29 = sld [smem:[#allocation6_spill]] }
 0x4e4   : > { %p17_p11 = scmp.ge.s32.totalorder %s20_s17, 10   ;;  %s3388_s10 = sld [smem:[#allocation7_spill]] }
 0x4e5   : > { %s3389_s11 = smov %s2453_s14  ;;  %s3390_s12 = smov %s2457_s15 }
 0x4e6   : > { %s3391_s13 = smov %s2461_s16  ;;  %s3392_s14 = smov %s3396_s0 }
 0x4e7   :  { %19 = sbr.rel (!%p17_p11) target bundleno = 4 (0x4), region = 97 }
 0x4e9   : > { %s3393_s15 = smov %s3387_s29 }
 0x4ea   : > { %s3394_s16 = smov %s3388_s10 }

</bundles_post_ra>
